<compile_context>
chip_gen: v7x
topology: tpu7x:2x2x1
jax: 0.10.0
libtpu: 0.0.40
codegen_flags: <defaults>
</compile_context>

<pallas_src>
import jax
import jax.numpy as jnp
from jax.experimental import pallas as pl
from jax.experimental.pallas import tpu as pltpu

Z_DIM = 100
H1, H2, H3 = 128, 256, 512
OUT_DIM = 1 * 28 * 28          # 784
Z_PAD = 128                    # 100 -> 128 (lane-aligned K for layer 1)


def _round_up(n, m):
    return ((n + m - 1) // m) * m


def _pad_to(a, shape):
    pads = [(0, s - d) for d, s in zip(a.shape, shape)]
    if all(p == (0, 0) for p in pads):
        return a
    return jnp.pad(a, pads)


def _generator_kernel(x_ref,
                      w1_ref, b1_ref,
                      w2_ref, b2_ref,
                      w3_ref, b3_ref,
                      w4_ref, b4_ref,
                      o_ref):
    # Layer 1: Linear(100->128) + ReLU   (K zero-padded to 128)
    h = jnp.dot(x_ref[...], w1_ref[...], preferred_element_type=jnp.float32)
    h = jnp.maximum(h + b1_ref[...], 0.0).astype(jnp.bfloat16)
    # Layer 2: Linear(128->256) + ReLU
    h = jnp.dot(h, w2_ref[...], preferred_element_type=jnp.float32)
    h = jnp.maximum(h + b2_ref[...], 0.0).astype(jnp.bfloat16)
    # Layer 3: Linear(256->512) + ReLU
    h = jnp.dot(h, w3_ref[...], preferred_element_type=jnp.float32)
    h = jnp.maximum(h + b3_ref[...], 0.0).astype(jnp.bfloat16)
    # Layer 4: Linear(512->784) + Tanh  (true N=784; bf16 store)
    h = jnp.dot(h, w4_ref[...], preferred_element_type=jnp.float32)
    o_ref[...] = jnp.tanh(h + b4_ref[...]).astype(o_ref.dtype)


def pack_params(params):
    """One-time weight packing (pad + bf16 cast). Do this once and reuse the
    result across forward calls — removes a per-call XLA pad/convert pass."""
    bf16 = jnp.bfloat16
    return {
        "w1": _pad_to(params["w1"], (Z_PAD, H1)).astype(bf16),
        "w2": params["w2"].astype(bf16),
        "w3": params["w3"].astype(bf16),
        "w4": params["w4"].astype(bf16),          # (512, 784), full-dim block
        "b1": params["b1"],                        # biases stay f32
        "b2": params["b2"],
        "b3": params["b3"],
        "b4": params["b4"],
    }


def _default_batch_tile():
    # v5e: 16 MiB scoped-VMEM default + 4x128^2 MXU -> TB=256.
    # v6e/v7x: TB=512 keeps the 2x256^2 MXU pipeline full, ~10-12 MiB VMEM.
    try:
        kind = jax.devices()[0].device_kind.lower()
    except Exception:
        return 256
    return 256 if "v5" in kind else 512


def generator_forward(x, packed, tb=None):
    """x: (B, 100) float32 (or bf16).  packed: output of pack_params().
    Returns (B, 784) bfloat16 (tanh output; upcast downstream if needed)."""
    B = x.shape[0]
    if tb is None:
        tb = _default_batch_tile()

    # Batch tile: multiple of 8 (sublane); clamp so the grid has >=2 steps
    # whenever the batch allows (so both v7x TensorCores get work).
    TB = max(8, min(_round_up(tb, 8), _round_up(pl.cdiv(B, 2), 8)))
    B_pad = _round_up(B, TB)
    grid = (B_pad // TB,)

    x_p = _pad_to(x, (B_pad, Z_PAD)).astype(jnp.bfloat16)
    w1, w2, w3, w4 = packed["w1"], packed["w2"], packed["w3"], packed["w4"]
    b1, b2, b3, b4 = packed["b1"], packed["b2"], packed["b3"], packed["b4"]

    # Constant index maps -> weights/biases stay VMEM-resident across steps.
    fixed = lambda a: pl.BlockSpec(a.shape, lambda i: (0,) * a.ndim)

    flops = 2 * B_pad * (Z_PAD * H1 + H1 * H2 + H2 * H3 + H3 * OUT_DIM)
    bytes_accessed = (int(x_p.size) * x_p.dtype.itemsize
                      + sum(int(a.size) * a.dtype.itemsize
                            for a in (w1, b1, w2, b2, w3, b3, w4, b4))
                      + B_pad * OUT_DIM * 2)          # bf16 output
    cost = pl.CostEstimate(flops=flops,
                           transcendentals=B_pad * OUT_DIM,
                           bytes_accessed=bytes_accessed)

    out = pl.pallas_call(
        _generator_kernel,
        out_shape=jax.ShapeDtypeStruct((B_pad, OUT_DIM), jnp.bfloat16),
        grid=grid,
        in_specs=[
            pl.BlockSpec((TB, Z_PAD), lambda i: (i, 0)),   # x tile (pipelined)
            fixed(w1), fixed(b1),
            fixed(w2), fixed(b2),
            fixed(w3), fixed(b3),
            fixed(w4), fixed(b4),
        ],
        # Block last dim == full array last dim (784), so it is legal even
        # though 784 is not a multiple of 128; only the final 16-lane group
        # gets a masked store.
        out_specs=pl.BlockSpec((TB, OUT_DIM), lambda i: (i, 0)),
        compiler_params=pltpu.CompilerParams(
            dimension_semantics=("parallel",)),
        cost_estimate=cost,
    )(x_p, w1, b1, w2, b2, w3, b3, w4, b4)

    # Only crop batch padding (cheap contiguous row slice; usually a no-op).
    return out if B_pad == B else out[:B]


def init_params(key):
    """Deterministic init mirroring PyTorch nn.Linear default:
    U(-1/sqrt(fan_in), 1/sqrt(fan_in)) for both weight and bias.
    Weights stored as (in_features, out_features), f32 master copies."""
    dims = [(Z_DIM, H1), (H1, H2), (H2, H3), (H3, OUT_DIM)]
    params = {}
    keys = jax.random.split(key, 2 * len(dims))
    for idx, (fan_in, fan_out) in enumerate(dims):
        bound = 1.0 / jnp.sqrt(jnp.float32(fan_in))
        w = jax.random.uniform(keys[2 * idx], (fan_in, fan_out),
                               minval=-bound, maxval=bound, dtype=jnp.float32)
        b = jax.random.uniform(keys[2 * idx + 1], (1, fan_out),
                               minval=-bound, maxval=bound, dtype=jnp.float32)
        params[f"w{idx + 1}"] = w
        params[f"b{idx + 1}"] = b
    return params


def _reference_forward(x, params):
    """Pure-JAX reference mirroring the kernel's bf16 weight/activation casts
    (isolates kernel bugs from bf16 rounding). Returns f32."""
    f32 = jnp.float32
    bf = lambda a: a.astype(jnp.bfloat16).astype(f32)
    h = jnp.maximum(bf(x) @ bf(params["w1"]) + params["b1"], 0.0)
    h = jnp.maximum(bf(h) @ bf(params["w2"]) + params["b2"], 0.0)
    h = jnp.maximum(bf(h) @ bf(params["w3"]) + params["b3"], 0.0)
    return jnp.tanh(bf(h) @ bf(params["w4"]) + params["b4"])


if __name__ == "__main__":
    key = jax.random.PRNGKey(0)
    k_params, k_x = jax.random.split(key)
    params = init_params(k_params)
    packed = pack_params(params)        # one-time pad + bf16 cast

    B = 16  # small batch
    x = jax.random.normal(k_x, (B, Z_DIM), dtype=jnp.float32)
    ref = _reference_forward(x, params)

    # Explicit small tile -> multi-step grid (TB=8 -> grid=(2,)).
    out_tiled = jax.block_until_ready(generator_forward(x, packed, tb=8))
    # Chip-aware default tile (still >=2 grid steps for B=16).
    out_default = jax.block_until_ready(generator_forward(x, packed))

    for out in (out_tiled, out_default):
        assert out.shape == (B, OUT_DIM), out.shape
        assert out.dtype == jnp.bfloat16, out.dtype
        err = float(jnp.max(jnp.abs(out.astype(jnp.float32) - ref)))
        assert jnp.allclose(out.astype(jnp.float32), ref,
                            atol=2e-2, rtol=2e-2), err

    print("KERNEL_OK")
</pallas_src>

<mosaic_0001>
module attributes {stable_mosaic.version = 11 : i64} {
  func.func @_generator_kernel(%arg0: i32, %arg1: memref<8x128xbf16, #tpu.memory_space<vmem>>, %arg2: memref<128x128xbf16, #tpu.memory_space<vmem>>, %arg3: memref<1x128xf32, #tpu.memory_space<vmem>>, %arg4: memref<128x256xbf16, #tpu.memory_space<vmem>>, %arg5: memref<1x256xf32, #tpu.memory_space<vmem>>, %arg6: memref<256x512xbf16, #tpu.memory_space<vmem>>, %arg7: memref<1x512xf32, #tpu.memory_space<vmem>>, %arg8: memref<512x784xbf16, #tpu.memory_space<vmem>>, %arg9: memref<1x784xf32, #tpu.memory_space<vmem>>, %arg10: memref<8x784xbf16, #tpu.memory_space<vmem>>) attributes {dimension_semantics = [#tpu.dimension_semantics<parallel>], iteration_bounds = array<i64: 2>, scalar_prefetch = 0 : i64, scratch_operands = 0 : i64, tpu.core_type = #tpu.core_type<tc>, window_params = [{transform_indices = @transform_0, window_bounds = array<i64: 8, 128>}, {pipeline_mode = #tpu.pipeline_mode<synchronous>, transform_indices = @transform_1, window_bounds = array<i64: 128, 128>}, {pipeline_mode = #tpu.pipeline_mode<synchronous>, transform_indices = @transform_2, window_bounds = array<i64: 1, 128>}, {pipeline_mode = #tpu.pipeline_mode<synchronous>, transform_indices = @transform_3, window_bounds = array<i64: 128, 256>}, {pipeline_mode = #tpu.pipeline_mode<synchronous>, transform_indices = @transform_4, window_bounds = array<i64: 1, 256>}, {pipeline_mode = #tpu.pipeline_mode<synchronous>, transform_indices = @transform_5, window_bounds = array<i64: 256, 512>}, {pipeline_mode = #tpu.pipeline_mode<synchronous>, transform_indices = @transform_6, window_bounds = array<i64: 1, 512>}, {pipeline_mode = #tpu.pipeline_mode<synchronous>, transform_indices = @transform_7, window_bounds = array<i64: 512, 784>}, {pipeline_mode = #tpu.pipeline_mode<synchronous>, transform_indices = @transform_8, window_bounds = array<i64: 1, 784>}, {transform_indices = @transform_9, window_bounds = array<i64: 8, 784>}]} {
    %c0 = arith.constant 0 : index
    %c0_0 = arith.constant 0 : index
    %0 = vector.load %arg1[%c0, %c0_0] : memref<8x128xbf16, #tpu.memory_space<vmem>>, vector<8x128xbf16>
    %c0_1 = arith.constant 0 : index
    %c0_2 = arith.constant 0 : index
    %1 = vector.load %arg2[%c0_1, %c0_2] : memref<128x128xbf16, #tpu.memory_space<vmem>>, vector<128x128xbf16>
    %cst = arith.constant dense<0.000000e+00> : vector<8x128xf32>
    %2 = tpu.matmul %0, %1, %cst {dimension_numbers = #tpu.dot_dimension_numbers<[1], [0], [0], [1], [0, 0, 1, 1], [], []>} : vector<8x128xbf16>, vector<128x128xbf16>, vector<8x128xf32> -> vector<8x128xf32>
    %c0_3 = arith.constant 0 : index
    %c0_4 = arith.constant 0 : index
    %3 = vector.load %arg3[%c0_3, %c0_4] : memref<1x128xf32, #tpu.memory_space<vmem>>, vector<1x128xf32>
    %4 = vector.broadcast %3 : vector<1x128xf32> to vector<8x128xf32>
    %5 = arith.addf %2, %4 : vector<8x128xf32>
    %cst_5 = arith.constant 0.000000e+00 : f32
    %6 = vector.broadcast %cst_5 : f32 to vector<8x128xf32>
    %7 = arith.maximumf %5, %6 : vector<8x128xf32>
    %8 = arith.truncf %7 : vector<8x128xf32> to vector<8x128xbf16>
    %c0_6 = arith.constant 0 : index
    %c0_7 = arith.constant 0 : index
    %9 = vector.load %arg4[%c0_6, %c0_7] : memref<128x256xbf16, #tpu.memory_space<vmem>>, vector<128x256xbf16>
    %cst_8 = arith.constant dense<0.000000e+00> : vector<8x256xf32>
    %10 = tpu.matmul %8, %9, %cst_8 {dimension_numbers = #tpu.dot_dimension_numbers<[1], [0], [0], [1], [0, 0, 1, 1], [], []>} : vector<8x128xbf16>, vector<128x256xbf16>, vector<8x256xf32> -> vector<8x256xf32>
    %c0_9 = arith.constant 0 : index
    %c0_10 = arith.constant 0 : index
    %11 = vector.load %arg5[%c0_9, %c0_10] : memref<1x256xf32, #tpu.memory_space<vmem>>, vector<1x256xf32>
    %12 = vector.broadcast %11 : vector<1x256xf32> to vector<8x256xf32>
    %13 = arith.addf %10, %12 : vector<8x256xf32>
    %cst_11 = arith.constant 0.000000e+00 : f32
    %14 = vector.broadcast %cst_11 : f32 to vector<8x256xf32>
    %15 = arith.maximumf %13, %14 : vector<8x256xf32>
    %16 = arith.truncf %15 : vector<8x256xf32> to vector<8x256xbf16>
    %c0_12 = arith.constant 0 : index
    %c0_13 = arith.constant 0 : index
    %17 = vector.load %arg6[%c0_12, %c0_13] : memref<256x512xbf16, #tpu.memory_space<vmem>>, vector<256x512xbf16>
    %cst_14 = arith.constant dense<0.000000e+00> : vector<8x512xf32>
    %18 = tpu.matmul %16, %17, %cst_14 {dimension_numbers = #tpu.dot_dimension_numbers<[1], [0], [0], [1], [0, 0, 1, 1], [], []>} : vector<8x256xbf16>, vector<256x512xbf16>, vector<8x512xf32> -> vector<8x512xf32>
    %c0_15 = arith.constant 0 : index
    %c0_16 = arith.constant 0 : index
    %19 = vector.load %arg7[%c0_15, %c0_16] : memref<1x512xf32, #tpu.memory_space<vmem>>, vector<1x512xf32>
    %20 = vector.broadcast %19 : vector<1x512xf32> to vector<8x512xf32>
    %21 = arith.addf %18, %20 : vector<8x512xf32>
    %cst_17 = arith.constant 0.000000e+00 : f32
    %22 = vector.broadcast %cst_17 : f32 to vector<8x512xf32>
    %23 = arith.maximumf %21, %22 : vector<8x512xf32>
    %24 = arith.truncf %23 : vector<8x512xf32> to vector<8x512xbf16>
    %c0_18 = arith.constant 0 : index
    %c0_19 = arith.constant 0 : index
    %25 = vector.load %arg8[%c0_18, %c0_19] : memref<512x784xbf16, #tpu.memory_space<vmem>>, vector<512x784xbf16>
    %cst_20 = arith.constant dense<0.000000e+00> : vector<8x784xf32>
    %26 = tpu.matmul %24, %25, %cst_20 {dimension_numbers = #tpu.dot_dimension_numbers<[1], [0], [0], [1], [0, 0, 1, 1], [], []>} : vector<8x512xbf16>, vector<512x784xbf16>, vector<8x784xf32> -> vector<8x784xf32>
    %c0_21 = arith.constant 0 : index
    %c0_22 = arith.constant 0 : index
    %27 = vector.load %arg9[%c0_21, %c0_22] : memref<1x784xf32, #tpu.memory_space<vmem>>, vector<1x784xf32>
    %28 = vector.broadcast %27 : vector<1x784xf32> to vector<8x784xf32>
    %29 = arith.addf %26, %28 : vector<8x784xf32>
    %30 = math.tanh %29 : vector<8x784xf32>
    %31 = arith.truncf %30 : vector<8x784xf32> to vector<8x784xbf16>
    %c0_23 = arith.constant 0 : index
    %c0_24 = arith.constant 0 : index
    %32 = vector.load %arg10[%c0_23, %c0_24] : memref<8x784xbf16, #tpu.memory_space<vmem>>, vector<8x784xbf16>
    tpu.vector_store %arg10[%c0_23, %c0_24], %31 {strides = array<i32>} : memref<8x784xbf16, #tpu.memory_space<vmem>>, vector<8x784xbf16>,
    return
  }
  func.func @transform_0(%arg0: i32) -> (i32, i32) {
    %c0_i32 = arith.constant 0 : i32
    %c0_i32_0 = arith.constant 0 : i32
    return %arg0, %c0_i32 : i32, i32
  }
  func.func @transform_1(%arg0: i32) -> (i32, i32) {
    %c0_i32 = arith.constant 0 : i32
    %c0_i32_0 = arith.constant 0 : i32
    %c0_i32_1 = arith.constant 0 : i32
    return %c0_i32, %c0_i32_0 : i32, i32
  }
  func.func @transform_2(%arg0: i32) -> (i32, i32) {
    %c0_i32 = arith.constant 0 : i32
    %c0_i32_0 = arith.constant 0 : i32
    %c0_i32_1 = arith.constant 0 : i32
    return %c0_i32, %c0_i32_0 : i32, i32
  }
  func.func @transform_3(%arg0: i32) -> (i32, i32) {
    %c0_i32 = arith.constant 0 : i32
    %c0_i32_0 = arith.constant 0 : i32
    %c0_i32_1 = arith.constant 0 : i32
    return %c0_i32, %c0_i32_0 : i32, i32
  }
  func.func @transform_4(%arg0: i32) -> (i32, i32) {
    %c0_i32 = arith.constant 0 : i32
    %c0_i32_0 = arith.constant 0 : i32
    %c0_i32_1 = arith.constant 0 : i32
    return %c0_i32, %c0_i32_0 : i32, i32
  }
  func.func @transform_5(%arg0: i32) -> (i32, i32) {
    %c0_i32 = arith.constant 0 : i32
    %c0_i32_0 = arith.constant 0 : i32
    %c0_i32_1 = arith.constant 0 : i32
    return %c0_i32, %c0_i32_0 : i32, i32
  }
  func.func @transform_6(%arg0: i32) -> (i32, i32) {
    %c0_i32 = arith.constant 0 : i32
    %c0_i32_0 = arith.constant 0 : i32
    %c0_i32_1 = arith.constant 0 : i32
    return %c0_i32, %c0_i32_0 : i32, i32
  }
  func.func @transform_7(%arg0: i32) -> (i32, i32) {
    %c0_i32 = arith.constant 0 : i32
    %c0_i32_0 = arith.constant 0 : i32
    %c0_i32_1 = arith.constant 0 : i32
    return %c0_i32, %c0_i32_0 : i32, i32
  }
  func.func @transform_8(%arg0: i32) -> (i32, i32) {
    %c0_i32 = arith.constant 0 : i32
    %c0_i32_0 = arith.constant 0 : i32
    %c0_i32_1 = arith.constant 0 : i32
    return %c0_i32, %c0_i32_0 : i32, i32
  }
  func.func @transform_9(%arg0: i32) -> (i32, i32) {
    %c0_i32 = arith.constant 0 : i32
    %c0_i32_0 = arith.constant 0 : i32
    return %arg0, %c0_i32 : i32, i32
  }
}

</mosaic_0001>

<bundles_post_ra>
// kernel: tpu_custom_call.1
= control target key start
LH: loop header
LB: loop body
LE: loop exit
PB: predicated region body
PF: predicated region fallthrough
CT: control target
= control target key end

     0   :  { %14 = vsyncpa [#allocation3], 0  ;;  %s5141_s0 = inlined_call_operand.vmem [shape: bf16[16,128], index: 0, kind: input, shape index: {}]   ;;  %s5142_s1 = inlined_call_operand.vmem [shape: bf16[128,128], index: 1, kind: input, shape index: {}]   ;;  %s5143_s2 = inlined_call_operand.vmem [shape: f32[1,128], index: 2, kind: input, shape index: {}]   ;;  %s5144_s3 = inlined_call_operand.vmem [shape: bf16[128,256], index: 3, kind: input, shape index: {}]   ;;  %s5145_s4 = inlined_call_operand.vmem [shape: f32[1,256], index: 4, kind: input, shape index: {}]   ;;  %s5146_s5 = inlined_call_operand.vmem [shape: bf16[256,512], index: 5, kind: input, shape index: {}]   ;;  %s5147_s6 = inlined_call_operand.vmem [shape: f32[1,512], index: 6, kind: input, shape index: {}]   ;;  %s5148_s7 = inlined_call_operand.vmem [shape: bf16[512,784], index: 7, kind: input, shape index: {}]   ;;  %s5149_s8 = inlined_call_operand.vmem [shape: f32[1,784], index: 8, kind: input, shape index: {}]   ;;  %s5150_s9 = inlined_call_operand.hbm [shape: bf16[16,784], index: 9, kind: output, shape index: {}]  }
   0x1   :  { %16 = vsyncpa [#allocation3 + $0x1], 0  ;;  %s4022_s30 = smov 0   ;;  %s4024_s10 = smov 0  }
   0x2   :  { %s4026_s11 = smov 0   ;;  %s4028_s12 = smov 0  }
   0x3 LB: > { %s4043_s13 = sadd.s32 4294967295, %s3966_s12   ;;  %s2978_s14 = sadd.s32 4294967294, %s3966_s12   ;;  %s3966_s12 = sphi %s4028_s12, %s5156_s12   ;;  %s3962_s11 = sphi %s4026_s11, %s5155_s11   ;;  %s3958_s10 = sphi %s4024_s10, %s5154_s10   ;;  %s3954_s30 = sphi %s4022_s30, %s5153_s30  }
   0x4   : > { %s4047_s15 = sadd.s32 1, %s3966_s12   ;;  %s223_s16 = sadd.s32 1, %s3962_s11 }
   0x5   : > { %s220_s17 = ssub.s32 %s3966_s12, %s4047_s15  ;;  %p233_p0 = scmp.ne.s32.totalorder %s3962_s11, %s3958_s10 }
   0x6   : > { %p221_p1 = scmp.eq.s32.totalorder %s220_s17, 0  ;;  %p234_p2 = scmp.eq.s32.totalorder %s4043_s13, 1 }
   0x7   : > { %p239_p3 = scmp.ne.s32.totalorder %s3958_s10, %s3954_s30  ;;  %p240_p4 = scmp.eq.s32.totalorder %s2978_s14, 1 }
   0x8   : > { %s4058_s18 = scalar_select %p221_p1, %s3962_s11, %s223_s16  }
   0x9   : > { %p4060_p5 = por %p234_p2, %p233_p0  ;;  %p4064_p6 = por %p240_p4, %p239_p3 }
   0xa   : > { %p2981_p7 = scmp.ge.s32.totalorder %s3966_s12, 1  ;;  %p289_p8 = scmp.lt.s32.totalorder %s3966_s12, 3 }
   0xc   : > { %p290_p9 = pnand %p2981_p7, %p289_p8 }
   0xd   : > { %v3442_v0 = vld [vmem:[%s5142_s1] sm:$0xff] (!%p290_p9)   ;;  %v3968_v1 = vmov (!%p290_p9), 0.0   ;;  %v3443_v2 = vld [vmem:[%s5142_s1 + $0x8] sm:$0xff] (!%p290_p9)   ;;  %vm3969_vm0 = vmmov (!%p290_p9), 0   ;;  %v3444_v3 = vld [vmem:[%s5142_s1 + $0x10] sm:$0xff] (!%p290_p9)   ;;  %p324_p10 = scmp.lt.s32.totalorder (!%p290_p9), %s4043_s13, 1 }
   0xe   : > { %293 = sbr.rel (%p290_p9) target bundleno = 1138 (0x472), region = 56  ;;  %3360 = vmatprep.subr.bf16.mxu1 (!%p290_p9), %v3968_v1  ;;  %3376 = vmatprep.mubr.msk.bf16.mxu1 (!%p290_p9), %vm3969_vm0, %v3968_v1  ;;  %v3445_v4 = vld [vmem:[%s5142_s1 + $0x18] sm:$0xff] (!%p290_p9)   ;;  %v3446_v5 = vld [vmem:[%s5142_s1 + $0x20] sm:$0xff] (!%p290_p9)   ;;  %v3447_v6 = vld [vmem:[%s5142_s1 + $0x28] sm:$0xff] (!%p290_p9)   ;;  %v3970_v26 = vmov (!%p290_p9), 0   ;;  %vm2902_vm1 = vcmask (!%p290_p9), 125952  }
   0xf   : > { %3361 = vmatpush3.bf16.msra.mxu1 (!%p290_p9), %v3442_v0  ;;  %v3448_v7 = vld [vmem:[%s5142_s1 + $0x30] sm:$0xff] (!%p290_p9)   ;;  %v3449_v8 = vld [vmem:[%s5142_s1 + $0x38] sm:$0xff] (!%p290_p9)   ;;  %v3452_v9 = vld [vmem:[%s5144_s3 + $0x4] ss:$8 sps:$4 sm:$0xff] (!%p290_p9)   ;;  %s3399_s26 = smul.u32 (!%p290_p9), 448, %s4043_s13 }
  0x10   : > { %3362 = vmatprep.subr.bf16.mxu1 (!%p290_p9), %v3968_v1  ;;  %v3450_v11 = vld [vmem:[%s5144_s3] ss:$8 sps:$4 sm:$0xff] (!%p290_p9)   ;;  %v3455_v12 = vld [vmem:[%s5144_s3 + $0x14] ss:$8 sps:$4 sm:$0xff] (!%p290_p9)   ;;  %v3453_v13 = vld [vmem:[%s5144_s3 + $0x10] ss:$8 sps:$4 sm:$0xff] (!%p290_p9)  }
  0x11   : > { %v3458_v14 = vld [vmem:[%s5144_s3 + $0x24] ss:$8 sps:$4 sm:$0xff] (!%p290_p9)   ;;  %v3456_v15 = vld [vmem:[%s5144_s3 + $0x20] ss:$8 sps:$4 sm:$0xff] (!%p290_p9)   ;;  %v3461_v16 = vld [vmem:[%s5144_s3 + $0x34] ss:$8 sps:$4 sm:$0xff] (!%p290_p9)  }
  0x12   : > { %v3459_v17 = vld [vmem:[%s5144_s3 + $0x30] ss:$8 sps:$4 sm:$0xff] (!%p290_p9)   ;;  %v3464_v18 = vld [vmem:[%s5144_s3 + $0x44] ss:$8 sps:$4 sm:$0xff] (!%p290_p9)   ;;  %v3462_v19 = vld [vmem:[%s5144_s3 + $0x40] ss:$8 sps:$4 sm:$0xff] (!%p290_p9)  }
  0x13   : > { %3363 = vmatpush3.bf16.msra.mxu1 (!%p290_p9), %v3443_v2  ;;  %v3467_v20 = vld [vmem:[%s5144_s3 + $0x54] ss:$8 sps:$4 sm:$0xff] (!%p290_p9)   ;;  %v3465_v21 = vld [vmem:[%s5144_s3 + $0x50] ss:$8 sps:$4 sm:$0xff] (!%p290_p9)   ;;  %v3470_v22 = vld [vmem:[%s5144_s3 + $0x64] ss:$8 sps:$4 sm:$0xff] (!%p290_p9)  }
  0x14   : > { %3364 = vmatprep.subr.bf16.mxu1 (!%p290_p9), %v3968_v1  ;;  %v3468_v23 = vld [vmem:[%s5144_s3 + $0x60] ss:$8 sps:$4 sm:$0xff] (!%p290_p9)   ;;  %v3473_v24 = vld [vmem:[%s5144_s3 + $0x74] ss:$8 sps:$4 sm:$0xff] (!%p290_p9)   ;;  %v3471_v25 = vld [vmem:[%s5144_s3 + $0x70] ss:$8 sps:$4 sm:$0xff] (!%p290_p9)  }
  0x15   : > { %s325_s21 = scalar_select %p324_p10, %s4043_s13, 1  ;;  %v3474_v27 = vld [vmem:[%s5146_s5 + $0x4] ss:$16 sps:$4 sm:$0xff]   ;;  %v3478_v28 = vld [vmem:[%s5146_s5 + $0xc] ss:$16 sps:$4 sm:$0xff]  }
  0x16   : > { %v3479_v29 = vld [vmem:[%s5146_s5] ss:$16 sps:$4 sm:$0xff]   ;;  %v3480_v30 = vld [vmem:[%s5146_s5 + $0x24] ss:$16 sps:$4 sm:$0xff]   ;;  %1002 = vmatprep.subr.bf16.mxu0 %v3474_v27  ;;  %v3476_v63 = vld [vmem:[%s5146_s5 + $0x8] ss:$16 sps:$4 sm:$0xff]  }
  0x17   : > { %3365 = vmatpush3.bf16.msra.mxu1 %v3444_v3  ;;  %s2982_s24 = sshll.u32 %s325_s21, 2  ;;  %v3485_v31 = vld [vmem:[%s5146_s5 + $0x20] ss:$16 sps:$4 sm:$0xff]   ;;  %1003 = vmatpush1.bf16.msra.mxu0 %v3479_v29  ;;  %v3486_v32 = vld [vmem:[%s5146_s5 + $0x44] ss:$16 sps:$4 sm:$0xff]   ;;  %s321_s21 = sand.u32 1, %s3958_s10  }
  0x18   : > { %3366 = vmatprep.subr.bf16.mxu1 %v3968_v1  ;;  %s327_s29 = scalar_lea.vmem %s5141_s0, %s2982_s24  ;;  %1004 = vmatprep.subr.bf16.mxu0 %v3480_v30  ;;  %v3491_v33 = vld [vmem:[%s5146_s5 + $0x40] ss:$16 sps:$4 sm:$0xff]   ;;  %v3492_v34 = vld [vmem:[%s5146_s5 + $0x64] ss:$16 sps:$4 sm:$0xff]   ;;  %v3482_v2 = vld [vmem:[%s5146_s5 + $0x28] ss:$16 sps:$4 sm:$0xff]  }
  0x19   : > { %v329_v10 = vld [vmem:[%s327_s29] sm:$0xf]  ;;  %v3498_v36 = vld [vmem:[%s5146_s5 + $0x84] ss:$16 sps:$4 sm:$0xff]   ;;  %v3490_v3 = vld [vmem:[%s5146_s5 + $0x4c] ss:$16 sps:$4 sm:$0xff]   ;;  %s5096_s29 = scalar_lea.hbm %s5150_s9, %s3399_s26 }
  0x1a   : > { %v3497_v35 = vld [vmem:[%s5146_s5 + $0x60] ss:$16 sps:$4 sm:$0xff]   ;;  %v3504_v38 = vld [vmem:[%s5146_s5 + $0xa4] ss:$16 sps:$4 sm:$0xff]   ;;  %v3560_v29 = vld [vmem:[%s5146_s5 + $0x1c8] ss:$16 sps:$4 sm:$0xff]  }
  0x1b   : > { %3367 = vmatpush3.bf16.msra.mxu1 %v3445_v4  ;;  %1005 = vmatpush1.bf16.msra.mxu0 %v3485_v31  ;;  %v3503_v37 = vld [vmem:[%s5146_s5 + $0x80] ss:$16 sps:$4 sm:$0xff]   ;;  %v3510_v40 = vld [vmem:[%s5146_s5 + $0xc4] ss:$16 sps:$4 sm:$0xff]   ;;  %v3488_v4 = vld [vmem:[%s5146_s5 + $0x48] ss:$16 sps:$4 sm:$0xff]  }
  0x1c   : > { %3368 = vmatprep.subr.bf16.mxu1 %v3968_v1  ;;  %1006 = vmatprep.subr.bf16.mxu0 %v3486_v32  ;;  %v3509_v39 = vld [vmem:[%s5146_s5 + $0xa0] ss:$16 sps:$4 sm:$0xff]   ;;  %v3516_v42 = vld [vmem:[%s5146_s5 + $0xe4] ss:$16 sps:$4 sm:$0xff]   ;;  %v3568_v32 = vld [vmem:[%s5146_s5 + $0x1ec] ss:$16 sps:$4 sm:$0xff]  }
  0x1d   : > { %v3515_v41 = vld [vmem:[%s5146_s5 + $0xc0] ss:$16 sps:$4 sm:$0xff]   ;;  %v3522_v44 = vld [vmem:[%s5146_s5 + $0x104] ss:$16 sps:$4 sm:$0xff]   ;;  %s3398_s23 = smul.u32 28, %s321_s21  ;;  %s2905_s14 = scalar_lea.sflag [#allocation3], %s321_s21 }
  0x1e   : > { %v3521_v43 = vld [vmem:[%s5146_s5 + $0xe0] ss:$16 sps:$4 sm:$0xff]   ;;  %v3528_v46 = vld [vmem:[%s5146_s5 + $0x124] ss:$16 sps:$4 sm:$0xff]   ;;  %s3971_s13 = smov [#allocation2]  }
  0x1f   : > { %3369 = vmatpush3.bf16.msra.mxu1 %v3446_v5  ;;  %1007 = vmatpush1.bf16.msra.mxu0 %v3491_v33  ;;  %v3527_v45 = vld [vmem:[%s5146_s5 + $0x100] ss:$16 sps:$4 sm:$0xff]   ;;  %v3534_v48 = vld [vmem:[%s5146_s5 + $0x144] ss:$16 sps:$4 sm:$0xff]   ;;  %v3496_v5 = vld [vmem:[%s5146_s5 + $0x6c] ss:$16 sps:$4 sm:$0xff]  }
  0x20   : > { %3370 = vmatprep.subr.bf16.mxu1 %v3968_v1  ;;  %1008 = vmatprep.subr.bf16.mxu0 %v3492_v34  ;;  %v3533_v47 = vld [vmem:[%s5146_s5 + $0x120] ss:$16 sps:$4 sm:$0xff]   ;;  %v3540_v50 = vld [vmem:[%s5146_s5 + $0x164] ss:$16 sps:$4 sm:$0xff]   ;;  %v3566_v33 = vld [vmem:[%s5146_s5 + $0x1e8] ss:$16 sps:$4 sm:$0xff]  }
  0x21   : > { %v3539_v49 = vld [vmem:[%s5146_s5 + $0x140] ss:$16 sps:$4 sm:$0xff]   ;;  %v3546_v52 = vld [vmem:[%s5146_s5 + $0x184] ss:$16 sps:$4 sm:$0xff]   ;;  %s5083_s25 = scalar_lea.vmem [#allocation2], %s3398_s23  ;;  %s3908_s17 = sshll.u32 %s3971_s13, 4  ;;  %s3909_s17 = int_to_ptr.vmem [resolvable:$false] %s3908_s17 }
  0x22   : > { %v3545_v51 = vld [vmem:[%s5146_s5 + $0x160] ss:$16 sps:$4 sm:$0xff]   ;;  %v3552_v54 = vld [vmem:[%s5146_s5 + $0x1a4] ss:$16 sps:$4 sm:$0xff]   ;;  %s2919_s24 = sshll.u32 %s5083_s25, 4  ;;  %s3910_s22 = scalar_lea.vmem %s3909_s17, 896  ;;  %s5098_s24 = int_to_ptr.vmem [resolvable:$true] %s2919_s24 }
  0x23   : > { %3371 = vmatpush3.bf16.msra.mxu1 %v3447_v6  ;;  %1009 = vmatpush1.bf16.msra.mxu0 %v3497_v35  ;;  %v3551_v53 = vld [vmem:[%s5146_s5 + $0x180] ss:$16 sps:$4 sm:$0xff]   ;;  %v3494_v6 = vld [vmem:[%s5146_s5 + $0x68] ss:$16 sps:$4 sm:$0xff]   ;;  %v3558_v27 = vld [vmem:[%s5146_s5 + $0x1c4] ss:$16 sps:$4 sm:$0xff]   ;;  %p3911_p0 = scmp.lt.s32.totalorder %s5098_s24, %s3909_s17 }
  0x24   : > { %3372 = vmatprep.subr.bf16.mxu1 %v3968_v1  ;;  %1010 = vmatprep.subr.bf16.mxu0 %v3498_v36  ;;  %v3557_v55 = vld [vmem:[%s5146_s5 + $0x1a0] ss:$16 sps:$4 sm:$0xff]   ;;  %v3564_v31 = vld [vmem:[%s5146_s5 + $0x1e4] ss:$16 sps:$4 sm:$0xff]   ;;  %v3575_v36 = vld [vmem:[%s5148_s7 + $0xc] ss:$28 sps:$4 sm:$0xff]  }
  0x25   : > { %v2983_v56 = vld [vmem:[%s5143_s2] ss:$0 sm:$0xff]  ;;  %s3904_s16 = scalar_lea.vmem %s5098_s24, 448 }
  0x26   : > { %v3563_v30 = vld [vmem:[%s5146_s5 + $0x1c0] ss:$16 sps:$4 sm:$0xff]   ;;  %p3905_p11 = scmp.ne.s32.totalorder %s5098_s24, %s3904_s16  ;;  %p3912_p1 = scmp.lt.s32.totalorder %s3910_s22, %s3904_s16 }
  0x27   : > { %3373 = vmatpush3.bf16.msra.mxu1 %v3448_v7  ;;  %1011 = vmatpush1.bf16.msra.mxu0 %v3503_v37  ;;  %v3502_v7 = vld [vmem:[%s5146_s5 + $0x8c] ss:$16 sps:$4 sm:$0xff]   ;;  %v3569_v34 = vld [vmem:[%s5146_s5 + $0x1e0] ss:$16 sps:$4 sm:$0xff]   ;;  %v461_v37 = vlaneseq }
  0x28   : > { %3374 = vmatprep.subr.bf16.mxu1 %v3968_v1  ;;  %1012 = vmatprep.subr.bf16.mxu0 %v3504_v38  ;;  %v3484_v1 = vld [vmem:[%s5146_s5 + $0x2c] ss:$16 sps:$4 sm:$0xff]   ;;  %v3572_v35 = vld [vmem:[%s5148_s7 + $0x4] ss:$28 sps:$4 sm:$0xff]   ;;  %p3906_p12 = pnand %p3905_p11, %p4060_p5  ;;  %p3913_p2 = por %p3912_p1, %p3911_p0 }
  0x29   : > { %v4348_v38 = vshrl.u32 %v461_v37, 7  ;;  %v3647_v37 = vld [vmem:[%s5148_s7 + $0x2ac] ss:$28 sps:$4 sm:$0xff]  }
  0x2a   : > { %p3907_p13 = pneg %p3906_p12 }
  0x2b   : > { %3375 = vmatpush3.bf16.msra.mxu1 %v3449_v8  ;;  %1013 = vmatpush1.bf16.msra.mxu0 %v3509_v39  ;;  %v3500_v8 = vld [vmem:[%s5146_s5 + $0x88] ss:$16 sps:$4 sm:$0xff]   ;;  %v4351_v39 = vsub.s32 0, %v4348_v38 }
  0x2c   : > { %551 = vmatprep.subr.bf16.mxu1 %v3452_v9  ;;  %1014 = vmatprep.subr.bf16.mxu0 %v3510_v40  ;;  %v3508_v9 = vld [vmem:[%s5146_s5 + $0xac] ss:$16 sps:$4 sm:$0xff]   ;;  %v459_v40 = vld [vmem:[%s5145_s4] sm:$0x3]  ;;  %p3914_p3 = pnand %p3913_p2, %p3907_p13 }
  0x2e   : > { %3377 = vmatmul.mubr.bf16.vlgmr.msra.gmra.mrb[0].mxu1 %v329_v10  ;;  %v3506_v10 = vld [vmem:[%s5146_s5 + $0xa8] ss:$16 sps:$4 sm:$0xff]  }
  0x2f   : > { %552 = vmatpush1.bf16.msra.mxu1 %v3450_v11  ;;  %583 = vmatprep.mubr.bf16.mxu1 %v3970_v26  ;;  %v3514_v11 = vld [vmem:[%s5146_s5 + $0xcc] ss:$16 sps:$4 sm:$0xff]   ;;  %v3554_v26 = vld [vmem:[%s5146_s5 + $0x1a8] ss:$16 sps:$4 sm:$0xff]  }
  0x30   : > { %553 = vmatprep.subr.bf16.mxu1 %v3455_v12  ;;  %1015 = vmatpush1.bf16.msra.mxu0 %v3515_v41  ;;  %v3512_v12 = vld [vmem:[%s5146_s5 + $0xc8] ss:$16 sps:$4 sm:$0xff]   ;;  %v4357_v41 = vsub.s32 1, %v4348_v38 }
  0x31   : > { %1016 = vmatprep.subr.bf16.mxu0 %v3516_v42  ;;  %v464_v42 = vrot.slane %v459_v40, %v4351_v39 }
  0x33   : > { %554 = vmatpush1.bf16.msra.mxu1 %v3453_v13  ;;  %v3520_v13 = vld [vmem:[%s5146_s5 + $0xec] ss:$16 sps:$4 sm:$0xff]  }
  0x34   : > { %555 = vmatprep.subr.bf16.mxu1 %v3458_v14  ;;  %1017 = vmatpush1.bf16.msra.mxu0 %v3521_v43  ;;  %v3518_v14 = vld [vmem:[%s5146_s5 + $0xe8] ss:$16 sps:$4 sm:$0xff]   ;;  %v468_v43 = vrot.slane %v459_v40, %v4357_v41  ;;  %v3642_v40 = vld [vmem:[%s5148_s7 + $0x2a0] ss:$28 sps:$4 sm:$0xff]  }
  0x35   : > { %1018 = vmatprep.subr.bf16.mxu0 %v3522_v44 }
  0x37   : > { %556 = vmatpush1.bf16.msra.mxu1 %v3456_v15  ;;  %v3526_v15 = vld [vmem:[%s5146_s5 + $0x10c] ss:$16 sps:$4 sm:$0xff]  }
  0x38   : > { %557 = vmatprep.subr.bf16.mxu1 %v3461_v16  ;;  %1019 = vmatpush1.bf16.msra.mxu0 %v3527_v45  ;;  %v3524_v16 = vld [vmem:[%s5146_s5 + $0x108] ss:$16 sps:$4 sm:$0xff]  }
  0x39   : > { %1020 = vmatprep.subr.bf16.mxu0 %v3528_v46 }
  0x3b   : > { %558 = vmatpush1.bf16.msra.mxu1 %v3459_v17  ;;  %v3532_v17 = vld [vmem:[%s5146_s5 + $0x12c] ss:$16 sps:$4 sm:$0xff]  }
  0x3c   : > { %559 = vmatprep.subr.bf16.mxu1 %v3464_v18  ;;  %1021 = vmatpush1.bf16.msra.mxu0 %v3533_v47  ;;  %v3530_v18 = vld [vmem:[%s5146_s5 + $0x128] ss:$16 sps:$4 sm:$0xff]  }
  0x3d   : > { %1022 = vmatprep.subr.bf16.mxu0 %v3534_v48 }
  0x3f   : > { %560 = vmatpush1.bf16.msra.mxu1 %v3462_v19  ;;  %v3538_v19 = vld [vmem:[%s5146_s5 + $0x14c] ss:$16 sps:$4 sm:$0xff]  }
  0x40   : > { %561 = vmatprep.subr.bf16.mxu1 %v3467_v20  ;;  %1023 = vmatpush1.bf16.msra.mxu0 %v3539_v49  ;;  %v3536_v20 = vld [vmem:[%s5146_s5 + $0x148] ss:$16 sps:$4 sm:$0xff]  }
  0x41   : > { %1024 = vmatprep.subr.bf16.mxu0 %v3540_v50 }
  0x43   : > { %562 = vmatpush1.bf16.msra.mxu1 %v3465_v21  ;;  %v3544_v21 = vld [vmem:[%s5146_s5 + $0x16c] ss:$16 sps:$4 sm:$0xff]  }
  0x44   : > { %563 = vmatprep.subr.bf16.mxu1 %v3470_v22  ;;  %1025 = vmatpush1.bf16.msra.mxu0 %v3545_v51  ;;  %v3542_v22 = vld [vmem:[%s5146_s5 + $0x168] ss:$16 sps:$4 sm:$0xff]  }
  0x45   : > { %1026 = vmatprep.subr.bf16.mxu0 %v3546_v52 }
  0x47   : > { %564 = vmatpush1.bf16.msra.mxu1 %v3468_v23  ;;  %v3550_v23 = vld [vmem:[%s5146_s5 + $0x18c] ss:$16 sps:$4 sm:$0xff]  }
  0x48   : > { %565 = vmatprep.subr.bf16.mxu1 %v3473_v24  ;;  %1027 = vmatpush1.bf16.msra.mxu0 %v3551_v53  ;;  %v3548_v24 = vld [vmem:[%s5146_s5 + $0x188] ss:$16 sps:$4 sm:$0xff]   ;;  %v3570_v53 = vld [vmem:[%s5148_s7] ss:$28 sps:$4 sm:$0xff]  }
  0x49   : > { %1028 = vmatprep.subr.bf16.mxu0 %v3552_v54  ;;  %v3573_v54 = vld [vmem:[%s5148_s7 + $0x8] ss:$28 sps:$4 sm:$0xff]  }
  0x4b   : > { %566 = vmatpush1.bf16.msra.mxu1 %v3471_v25  ;;  %v3556_v25 = vld [vmem:[%s5146_s5 + $0x1ac] ss:$16 sps:$4 sm:$0xff]  }
  0x4c   : > { %1043 = vmatprep.subr.bf16.mxu1 %v3478_v28  ;;  %1029 = vmatpush1.bf16.msra.mxu0 %v3557_v55  ;;  %v3562_v28 = vld [vmem:[%s5146_s5 + $0x1cc] ss:$16 sps:$4 sm:$0xff]  }
  0x4d   : > { %1030 = vmatprep.subr.bf16.mxu0 %v3558_v27  ;;  %v3627_v27 = vld [vmem:[%s5148_s7 + $0x200] ss:$28 sps:$4 sm:$0xff]  }
  0x50   : > { %1031 = vmatpush1.bf16.msra.mxu0 %v3563_v30  ;;  %v3630_v30 = vld [vmem:[%s5148_s7 + $0x230] ss:$28 sps:$4 sm:$0xff]  }
  0x51   : > { %1032 = vmatprep.subr.bf16.mxu0 %v3564_v31  ;;  %v3633_v31 = vld [vmem:[%s5148_s7 + $0x238] ss:$28 sps:$4 sm:$0xff]  }
  0x54   : > { %1033 = vmatpush1.bf16.msra.mxu0 %v3569_v34  ;;  %v3636_v34 = vld [vmem:[%s5148_s7 + $0x268] ss:$28 sps:$4 sm:$0xff]  }
  0x55   : > { %2537 = vmatprep.subr.bf16.mxu0 %v3572_v35  ;;  %v3639_v35 = vld [vmem:[%s5148_s7 + $0x270] ss:$28 sps:$4 sm:$0xff]  }
 0x101   : > { %v435_v57 = vpop.f32.mrb[0].mxu1 }
 0x102   : > { %v436_v58 = vadd.f32 %v2983_v56, %v435_v57  ;;  %v3378_v59 = vpop.f32.mrb[1].mxu1  ;;  %v3578_v56 = vld [vmem:[%s5148_s7 + $0x3c] ss:$28 sps:$4 sm:$0xff]   ;;  %v3581_v57 = vld [vmem:[%s5148_s7 + $0x44] ss:$28 sps:$4 sm:$0xff]  }
 0x103   : > { %v438_v60 = vpop.f32.mrb[2].mxu1  ;;  %v3579_v59 = vld [vmem:[%s5148_s7 + $0x40] ss:$28 sps:$4 sm:$0xff]  }
 0x104   : > { %v441_v61 = vmax.f32 %v436_v58, 0.0  ;;  %v3379_v62 = vpop.f32.mrb[3].mxu1  ;;  %v3576_v58 = vld [vmem:[%s5148_s7 + $0x38] ss:$28 sps:$4 sm:$0xff]  }
 0x105   : > { %v3584_v60 = vld [vmem:[%s5148_s7 + $0x74] ss:$28 sps:$4 sm:$0xff]  }
 0x106   : > { %v442_v0 = vpack.c.bf16 %v441_v61, %v441_v61  ;;  %v3587_v61 = vld [vmem:[%s5148_s7 + $0x7c] ss:$28 sps:$4 sm:$0xff]   ;;  %v3582_v62 = vld [vmem:[%s5148_s7 + $0x70] ss:$28 sps:$4 sm:$0xff]  }
 0x108   : > { %584 = vmatmul.mubr.bf16.vlgmr.msra.gmra.mrb[4].mxu1 %v442_v0  ;;  %v3590_v0 = vld [vmem:[%s5148_s7 + $0xac] ss:$28 sps:$4 sm:$0xff]  }
 0x109   : > { %1044 = vmatpush1.bf16.msra.mxu1 %v3476_v63  ;;  %v3585_v63 = vld [vmem:[%s5148_s7 + $0x78] ss:$28 sps:$4 sm:$0xff]  }
 0x10a   : > { %1045 = vmatprep.subr.bf16.mxu1 %v3484_v1  ;;  %v3593_v1 = vld [vmem:[%s5148_s7 + $0xb4] ss:$28 sps:$4 sm:$0xff]  }
 0x10d   : > { %1046 = vmatpush1.bf16.msra.mxu1 %v3482_v2  ;;  %v3588_v2 = vld [vmem:[%s5148_s7 + $0xa8] ss:$28 sps:$4 sm:$0xff]  }
 0x10e   : > { %1047 = vmatprep.subr.bf16.mxu1 %v3490_v3  ;;  %v3591_v3 = vld [vmem:[%s5148_s7 + $0xb0] ss:$28 sps:$4 sm:$0xff]  }
 0x111   : > { %1048 = vmatpush1.bf16.msra.mxu1 %v3488_v4  ;;  %v3596_v4 = vld [vmem:[%s5148_s7 + $0xe4] ss:$28 sps:$4 sm:$0xff]  }
 0x112   : > { %1049 = vmatprep.subr.bf16.mxu1 %v3496_v5  ;;  %v3599_v5 = vld [vmem:[%s5148_s7 + $0xec] ss:$28 sps:$4 sm:$0xff]  }
 0x115   : > { %1050 = vmatpush1.bf16.msra.mxu1 %v3494_v6  ;;  %v3594_v6 = vld [vmem:[%s5148_s7 + $0xe0] ss:$28 sps:$4 sm:$0xff]  }
 0x116   : > { %1051 = vmatprep.subr.bf16.mxu1 %v3502_v7  ;;  %v3597_v7 = vld [vmem:[%s5148_s7 + $0xe8] ss:$28 sps:$4 sm:$0xff]  }
 0x119   : > { %1052 = vmatpush1.bf16.msra.mxu1 %v3500_v8  ;;  %v3602_v8 = vld [vmem:[%s5148_s7 + $0x11c] ss:$28 sps:$4 sm:$0xff]  }
 0x11a   : > { %1053 = vmatprep.subr.bf16.mxu1 %v3508_v9  ;;  %v3605_v9 = vld [vmem:[%s5148_s7 + $0x124] ss:$28 sps:$4 sm:$0xff]  }
 0x11d   : > { %1054 = vmatpush1.bf16.msra.mxu1 %v3506_v10  ;;  %v3600_v10 = vld [vmem:[%s5148_s7 + $0x118] ss:$28 sps:$4 sm:$0xff]  }
 0x11e   : > { %1055 = vmatprep.subr.bf16.mxu1 %v3514_v11  ;;  %v3603_v11 = vld [vmem:[%s5148_s7 + $0x120] ss:$28 sps:$4 sm:$0xff]  }
 0x121   : > { %1056 = vmatpush1.bf16.msra.mxu1 %v3512_v12  ;;  %v3608_v12 = vld [vmem:[%s5148_s7 + $0x154] ss:$28 sps:$4 sm:$0xff]  }
 0x122   : > { %1057 = vmatprep.subr.bf16.mxu1 %v3520_v13  ;;  %v3611_v13 = vld [vmem:[%s5148_s7 + $0x15c] ss:$28 sps:$4 sm:$0xff]  }
 0x125   : > { %1058 = vmatpush1.bf16.msra.mxu1 %v3518_v14  ;;  %v3606_v14 = vld [vmem:[%s5148_s7 + $0x150] ss:$28 sps:$4 sm:$0xff]  }
 0x126   : > { %1059 = vmatprep.subr.bf16.mxu1 %v3526_v15  ;;  %v3609_v15 = vld [vmem:[%s5148_s7 + $0x158] ss:$28 sps:$4 sm:$0xff]  }
 0x129   : > { %1060 = vmatpush1.bf16.msra.mxu1 %v3524_v16  ;;  %v3614_v16 = vld [vmem:[%s5148_s7 + $0x18c] ss:$28 sps:$4 sm:$0xff]  }
 0x12a   : > { %1061 = vmatprep.subr.bf16.mxu1 %v3532_v17  ;;  %v3617_v17 = vld [vmem:[%s5148_s7 + $0x194] ss:$28 sps:$4 sm:$0xff]  }
 0x12d   : > { %1062 = vmatpush1.bf16.msra.mxu1 %v3530_v18  ;;  %v3612_v18 = vld [vmem:[%s5148_s7 + $0x188] ss:$28 sps:$4 sm:$0xff]  }
 0x12e   : > { %1063 = vmatprep.subr.bf16.mxu1 %v3538_v19  ;;  %v3615_v19 = vld [vmem:[%s5148_s7 + $0x190] ss:$28 sps:$4 sm:$0xff]  }
 0x131   : > { %1064 = vmatpush1.bf16.msra.mxu1 %v3536_v20  ;;  %v3620_v20 = vld [vmem:[%s5148_s7 + $0x1c4] ss:$28 sps:$4 sm:$0xff]  }
 0x132   : > { %1065 = vmatprep.subr.bf16.mxu1 %v3544_v21  ;;  %v3623_v21 = vld [vmem:[%s5148_s7 + $0x1cc] ss:$28 sps:$4 sm:$0xff]  }
 0x135   : > { %1066 = vmatpush1.bf16.msra.mxu1 %v3542_v22  ;;  %v3618_v22 = vld [vmem:[%s5148_s7 + $0x1c0] ss:$28 sps:$4 sm:$0xff]  }
 0x136   : > { %1067 = vmatprep.subr.bf16.mxu1 %v3550_v23  ;;  %v3621_v23 = vld [vmem:[%s5148_s7 + $0x1c8] ss:$28 sps:$4 sm:$0xff]  }
 0x139   : > { %1068 = vmatpush1.bf16.msra.mxu1 %v3548_v24  ;;  %v3626_v24 = vld [vmem:[%s5148_s7 + $0x1fc] ss:$28 sps:$4 sm:$0xff]  }
 0x13a   : > { %1069 = vmatprep.subr.bf16.mxu1 %v3556_v25  ;;  %v3629_v25 = vld [vmem:[%s5148_s7 + $0x204] ss:$28 sps:$4 sm:$0xff]  }
 0x13d   : > { %1070 = vmatpush1.bf16.msra.mxu1 %v3554_v26  ;;  %v3624_v26 = vld [vmem:[%s5148_s7 + $0x1f8] ss:$28 sps:$4 sm:$0xff]  }
 0x13e   : > { %1071 = vmatprep.subr.bf16.mxu1 %v3562_v28  ;;  %v3632_v28 = vld [vmem:[%s5148_s7 + $0x234] ss:$28 sps:$4 sm:$0xff]  }
 0x141   : > { %1072 = vmatpush1.bf16.msra.mxu1 %v3560_v29  ;;  %v3635_v29 = vld [vmem:[%s5148_s7 + $0x23c] ss:$28 sps:$4 sm:$0xff]  }
 0x142   : > { %1073 = vmatprep.subr.bf16.mxu1 %v3568_v32  ;;  %v3638_v32 = vld [vmem:[%s5148_s7 + $0x26c] ss:$28 sps:$4 sm:$0xff]  }
 0x145   : > { %1074 = vmatpush1.bf16.msra.mxu1 %v3566_v33  ;;  %v3641_v33 = vld [vmem:[%s5148_s7 + $0x274] ss:$28 sps:$4 sm:$0xff]  }
 0x146   : > { %2619 = vmatprep.subr.bf16.mxu1 %v3575_v36  ;;  %v3644_v36 = vld [vmem:[%s5148_s7 + $0x2a4] ss:$28 sps:$4 sm:$0xff]  }
 0x1db   : > { %v585_v44 = vpop.f32.mrb[4].mxu1 }
 0x1dc   : > { %v586_v45 = vadd.f32 %v585_v44, %v464_v42  ;;  %v587_v46 = vpop.f32.mrb[5].mxu1  ;;  %v3645_v42 = vld [vmem:[%s5148_s7 + $0x2a8] ss:$28 sps:$4 sm:$0xff]  }
 0x1dd   : > { %v588_v47 = vadd.f32 %v587_v46, %v468_v43  ;;  %v589_v48 = vpop.f32.mrb[6].mxu1  ;;  %v3650_v43 = vld [vmem:[%s5148_s7 + $0x2dc] ss:$28 sps:$4 sm:$0xff]   ;;  %v3653_v44 = vld [vmem:[%s5148_s7 + $0x2e4] ss:$28 sps:$4 sm:$0xff]  }
 0x1de   : > { %v592_v49 = vmax.f32 %v586_v45, 0.0  ;;  %v590_v50 = vpop.f32.mrb[7].mxu1  ;;  %v3648_v45 = vld [vmem:[%s5148_s7 + $0x2d8] ss:$28 sps:$4 sm:$0xff]   ;;  %v3651_v46 = vld [vmem:[%s5148_s7 + $0x2e0] ss:$28 sps:$4 sm:$0xff]  }
 0x1df   : > { %v593_v51 = vmax.f32 %v588_v47, 0.0  ;;  %v3656_v47 = vld [vmem:[%s5148_s7 + $0x314] ss:$28 sps:$4 sm:$0xff]   ;;  %v3659_v48 = vld [vmem:[%s5148_s7 + $0x31c] ss:$28 sps:$4 sm:$0xff]  }
 0x1e0   : > { %v594_v55 = vpack.c.bf16 %v592_v49, %v592_v49  ;;  %v3654_v49 = vld [vmem:[%s5148_s7 + $0x310] ss:$28 sps:$4 sm:$0xff]   ;;  %v3657_v50 = vld [vmem:[%s5148_s7 + $0x318] ss:$28 sps:$4 sm:$0xff]  }
 0x1e1   : > { %v595_v52 = vpack.c.bf16 %v593_v51, %v593_v51  ;;  %v3662_v51 = vld [vmem:[%s5148_s7 + $0x34c] ss:$28 sps:$4 sm:$0xff]  }
 0x1e3   : > { %1034 = vmatprep.mubr.bf16.mxu0 %v595_v52  ;;  %1075 = vmatprep.mubr.bf16.mxu1 %v595_v52  ;;  %v3665_v52 = vld [vmem:[%s5148_s7 + $0x354] ss:$28 sps:$4 sm:$0xff]  }
 0x1e4   : > { %1035 = vmatmul.mubr.bf16.vlgmr.msra.gmra.mrb[0].mxu0 %v594_v55  ;;  %1076 = vmatmul.mubr.bf16.vlgmr.msra.gmra.mrb[8].mxu1 %v594_v55  ;;  %v3668_v55 = vld [vmem:[%s5148_s7 + $0x384] ss:$28 sps:$4 sm:$0xff]  }
 0x1e5   : > { %2538 = vmatpush1.bf16.msra.mxu0 %v3570_v53  ;;  %2620 = vmatpush1.bf16.msra.mxu1 %v3573_v54  ;;  %v3660_v53 = vld [vmem:[%s5148_s7 + $0x348] ss:$28 sps:$4 sm:$0xff]   ;;  %v3663_v54 = vld [vmem:[%s5148_s7 + $0x350] ss:$28 sps:$4 sm:$0xff]  }
 0x1e6   : > { %2539 = vmatprep.subr.bf16.mxu0 %v3578_v56  ;;  %2621 = vmatprep.subr.bf16.mxu1 %v3581_v57  ;;  %v3671_v56 = vld [vmem:[%s5148_s7 + $0x38c] ss:$28 sps:$4 sm:$0xff]   ;;  %v4556_v57 = vld [vmem:[%s5147_s6] sm:$0xf] }
 0x1e9   : > { %2540 = vmatpush1.bf16.msra.mxu0 %v3576_v58  ;;  %2622 = vmatpush1.bf16.msra.mxu1 %v3579_v59  ;;  %v676_v58 = vsub.s32 3, %v4348_v38  ;;  %v665_v59 = vrot.slane %v4556_v57, %v4351_v39 }
 0x1ea   : > { %2541 = vmatprep.subr.bf16.mxu0 %v3584_v60  ;;  %2623 = vmatprep.subr.bf16.mxu1 %v3587_v61  ;;  %v669_v60 = vrot.slane %v4556_v57, %v4357_v41 }
 0x1eb   : > { %v677_v61 = vrot.slane %v4556_v57, %v676_v58 }
 0x1ed   : > { %2542 = vmatpush1.bf16.msra.mxu0 %v3582_v62  ;;  %2624 = vmatpush1.bf16.msra.mxu1 %v3585_v63 }
 0x1ee   : > { %2543 = vmatprep.subr.bf16.mxu0 %v3590_v0  ;;  %2625 = vmatprep.subr.bf16.mxu1 %v3593_v1 }
 0x1f1   : > { %2544 = vmatpush1.bf16.msra.mxu0 %v3588_v2  ;;  %2626 = vmatpush1.bf16.msra.mxu1 %v3591_v3 }
 0x1f2   : > { %2545 = vmatprep.subr.bf16.mxu0 %v3596_v4  ;;  %2627 = vmatprep.subr.bf16.mxu1 %v3599_v5 }
 0x1f5   : > { %2546 = vmatpush1.bf16.msra.mxu0 %v3594_v6  ;;  %2628 = vmatpush1.bf16.msra.mxu1 %v3597_v7 }
 0x1f6   : > { %2547 = vmatprep.subr.bf16.mxu0 %v3602_v8  ;;  %2629 = vmatprep.subr.bf16.mxu1 %v3605_v9 }
 0x1f9   : > { %2548 = vmatpush1.bf16.msra.mxu0 %v3600_v10  ;;  %2630 = vmatpush1.bf16.msra.mxu1 %v3603_v11 }
 0x1fa   : > { %2549 = vmatprep.subr.bf16.mxu0 %v3608_v12  ;;  %2631 = vmatprep.subr.bf16.mxu1 %v3611_v13  ;;  %v3666_v13 = vld [vmem:[%s5148_s7 + $0x380] ss:$28 sps:$4 sm:$0xff]  }
 0x1fd   : > { %2550 = vmatpush1.bf16.msra.mxu0 %v3606_v14  ;;  %2632 = vmatpush1.bf16.msra.mxu1 %v3609_v15  ;;  %v3669_v14 = vld [vmem:[%s5148_s7 + $0x388] ss:$28 sps:$4 sm:$0xff]  }
 0x1fe   : > { %2551 = vmatprep.subr.bf16.mxu0 %v3614_v16  ;;  %2633 = vmatprep.subr.bf16.mxu1 %v3617_v17  ;;  %v3674_v16 = vld [vmem:[%s5148_s7 + $0x3bc] ss:$28 sps:$4 sm:$0xff]   ;;  %v3677_v17 = vld [vmem:[%s5148_s7 + $0x3c4] ss:$28 sps:$4 sm:$0xff]  }
 0x201   : > { %2552 = vmatpush1.bf16.msra.mxu0 %v3612_v18  ;;  %2634 = vmatpush1.bf16.msra.mxu1 %v3615_v19  ;;  %v3672_v19 = vld [vmem:[%s5148_s7 + $0x3b8] ss:$28 sps:$4 sm:$0xff]  }
 0x202   : > { %2553 = vmatprep.subr.bf16.mxu0 %v3620_v20  ;;  %2635 = vmatprep.subr.bf16.mxu1 %v3623_v21  ;;  %v3675_v20 = vld [vmem:[%s5148_s7 + $0x3c0] ss:$28 sps:$4 sm:$0xff]   ;;  %v3680_v21 = vld [vmem:[%s5148_s7 + $0x3f4] ss:$28 sps:$4 sm:$0xff]  }
 0x205   : > { %2554 = vmatpush1.bf16.msra.mxu0 %v3618_v22  ;;  %2636 = vmatpush1.bf16.msra.mxu1 %v3621_v23  ;;  %v3683_v22 = vld [vmem:[%s5148_s7 + $0x3fc] ss:$28 sps:$4 sm:$0xff]   ;;  %v3678_v23 = vld [vmem:[%s5148_s7 + $0x3f0] ss:$28 sps:$4 sm:$0xff]  }
 0x206   : > { %2555 = vmatprep.subr.bf16.mxu0 %v3626_v24  ;;  %2637 = vmatprep.subr.bf16.mxu1 %v3629_v25  ;;  %v3681_v24 = vld [vmem:[%s5148_s7 + $0x3f8] ss:$28 sps:$4 sm:$0xff]   ;;  %v3686_v25 = vld [vmem:[%s5148_s7 + $0x42c] ss:$28 sps:$4 sm:$0xff]  }
 0x209   : > { %2556 = vmatpush1.bf16.msra.mxu0 %v3624_v26  ;;  %2638 = vmatpush1.bf16.msra.mxu1 %v3627_v27  ;;  %v3689_v26 = vld [vmem:[%s5148_s7 + $0x434] ss:$28 sps:$4 sm:$0xff]   ;;  %v3684_v27 = vld [vmem:[%s5148_s7 + $0x428] ss:$28 sps:$4 sm:$0xff]  }
 0x20a   : > { %2557 = vmatprep.subr.bf16.mxu0 %v3632_v28  ;;  %2639 = vmatprep.subr.bf16.mxu1 %v3635_v29  ;;  %v3687_v28 = vld [vmem:[%s5148_s7 + $0x430] ss:$28 sps:$4 sm:$0xff]   ;;  %v3692_v29 = vld [vmem:[%s5148_s7 + $0x464] ss:$28 sps:$4 sm:$0xff]  }
 0x20d   : > { %2558 = vmatpush1.bf16.msra.mxu0 %v3630_v30  ;;  %2640 = vmatpush1.bf16.msra.mxu1 %v3633_v31  ;;  %v3695_v30 = vld [vmem:[%s5148_s7 + $0x46c] ss:$28 sps:$4 sm:$0xff]   ;;  %v3690_v31 = vld [vmem:[%s5148_s7 + $0x460] ss:$28 sps:$4 sm:$0xff]  }
 0x20e   : > { %2559 = vmatprep.subr.bf16.mxu0 %v3638_v32  ;;  %2641 = vmatprep.subr.bf16.mxu1 %v3641_v33  ;;  %v3693_v32 = vld [vmem:[%s5148_s7 + $0x468] ss:$28 sps:$4 sm:$0xff]   ;;  %v3698_v33 = vld [vmem:[%s5148_s7 + $0x49c] ss:$28 sps:$4 sm:$0xff]  }
 0x211   : > { %2560 = vmatpush1.bf16.msra.mxu0 %v3636_v34  ;;  %2642 = vmatpush1.bf16.msra.mxu1 %v3639_v35  ;;  %v3701_v34 = vld [vmem:[%s5148_s7 + $0x4a4] ss:$28 sps:$4 sm:$0xff]   ;;  %v3696_v35 = vld [vmem:[%s5148_s7 + $0x498] ss:$28 sps:$4 sm:$0xff]  }
 0x212   : > { %2561 = vmatprep.subr.bf16.mxu0 %v3644_v36  ;;  %2643 = vmatprep.subr.bf16.mxu1 %v3647_v37  ;;  %v3699_v36 = vld [vmem:[%s5148_s7 + $0x4a0] ss:$28 sps:$4 sm:$0xff]   ;;  %v3704_v37 = vld [vmem:[%s5148_s7 + $0x4d4] ss:$28 sps:$4 sm:$0xff]  }
 0x215   : > { %2562 = vmatpush1.bf16.msra.mxu0 %v3642_v40  ;;  %2644 = vmatpush1.bf16.msra.mxu1 %v3645_v42  ;;  %v3707_v40 = vld [vmem:[%s5148_s7 + $0x4dc] ss:$28 sps:$4 sm:$0xff]   ;;  %v3702_v42 = vld [vmem:[%s5148_s7 + $0x4d0] ss:$28 sps:$4 sm:$0xff]  }
 0x216   : > { %2563 = vmatprep.subr.bf16.mxu0 %v3650_v43  ;;  %2645 = vmatprep.subr.bf16.mxu1 %v3653_v44  ;;  %v3705_v43 = vld [vmem:[%s5148_s7 + $0x4d8] ss:$28 sps:$4 sm:$0xff]   ;;  %v3710_v44 = vld [vmem:[%s5148_s7 + $0x50c] ss:$28 sps:$4 sm:$0xff]  }
 0x219   : > { %2564 = vmatpush1.bf16.msra.mxu0 %v3648_v45  ;;  %2646 = vmatpush1.bf16.msra.mxu1 %v3651_v46  ;;  %v3713_v45 = vld [vmem:[%s5148_s7 + $0x514] ss:$28 sps:$4 sm:$0xff]   ;;  %v3708_v46 = vld [vmem:[%s5148_s7 + $0x508] ss:$28 sps:$4 sm:$0xff]  }
 0x21a   : > { %2565 = vmatprep.subr.bf16.mxu0 %v3656_v47  ;;  %2647 = vmatprep.subr.bf16.mxu1 %v3659_v48  ;;  %v3711_v47 = vld [vmem:[%s5148_s7 + $0x510] ss:$28 sps:$4 sm:$0xff]   ;;  %v3716_v48 = vld [vmem:[%s5148_s7 + $0x544] ss:$28 sps:$4 sm:$0xff]  }
 0x21d   : > { %2566 = vmatpush1.bf16.msra.mxu0 %v3654_v49  ;;  %2648 = vmatpush1.bf16.msra.mxu1 %v3657_v50  ;;  %v3719_v49 = vld [vmem:[%s5148_s7 + $0x54c] ss:$28 sps:$4 sm:$0xff]   ;;  %v3714_v50 = vld [vmem:[%s5148_s7 + $0x540] ss:$28 sps:$4 sm:$0xff]  }
 0x21e   : > { %2567 = vmatprep.subr.bf16.mxu0 %v3662_v51  ;;  %2649 = vmatprep.subr.bf16.mxu1 %v3665_v52  ;;  %v3717_v51 = vld [vmem:[%s5148_s7 + $0x548] ss:$28 sps:$4 sm:$0xff]   ;;  %v3722_v52 = vld [vmem:[%s5148_s7 + $0x57c] ss:$28 sps:$4 sm:$0xff]  }
 0x221   : > { %2568 = vmatpush1.bf16.msra.mxu0 %v3660_v53  ;;  %2650 = vmatpush1.bf16.msra.mxu1 %v3663_v54  ;;  %v3725_v53 = vld [vmem:[%s5148_s7 + $0x584] ss:$28 sps:$4 sm:$0xff]   ;;  %v3720_v54 = vld [vmem:[%s5148_s7 + $0x578] ss:$28 sps:$4 sm:$0xff]  }
 0x222   : > { %2578 = vmatprep.subr.bf16.mxu0 %v3668_v55  ;;  %2660 = vmatprep.subr.bf16.mxu1 %v3671_v56  ;;  %v3723_v55 = vld [vmem:[%s5148_s7 + $0x580] ss:$28 sps:$4 sm:$0xff]   ;;  %v3728_v56 = vld [vmem:[%s5148_s7 + $0x5b4] ss:$28 sps:$4 sm:$0xff]  }
 0x2b7   : > { %v1036_v62 = vpop.f32.mrb[0].mxu0  ;;  %v4566_v63 = vpop.f32.mrb[8].mxu1 }
 0x2b8   : > { %v1037_v0 = vadd.f32 %v1036_v62, %v665_v59  ;;  %v1038_v1 = vpop.f32.mrb[1].mxu0  ;;  %v1079_v2 = vpop.f32.mrb[9].mxu1  ;;  %v3731_v59 = vld [vmem:[%s5148_s7 + $0x5bc] ss:$28 sps:$4 sm:$0xff]   ;;  %v3734_v62 = vld [vmem:[%s5148_s7 + $0x5ec] ss:$28 sps:$4 sm:$0xff]  }
 0x2b9   : > { %v1039_v3 = vadd.f32 %v1038_v1, %v669_v60  ;;  %v1080_v4 = vadd.f32 %v1079_v2, %v677_v61  ;;  %v1040_v5 = vpop.f32.mrb[2].mxu0  ;;  %v1081_v6 = vpop.f32.mrb[10].mxu1  ;;  %v3726_v60 = vld [vmem:[%s5148_s7 + $0x5b0] ss:$28 sps:$4 sm:$0xff]   ;;  %v3729_v61 = vld [vmem:[%s5148_s7 + $0x5b8] ss:$28 sps:$4 sm:$0xff]  }
 0x2ba   : > { %v1084_v7 = vmax.f32 %v1037_v0, 0.0  ;;  %v1041_v8 = vpop.f32.mrb[3].mxu0  ;;  %v1082_v9 = vpop.f32.mrb[11].mxu1  ;;  %v3737_v0 = vld [vmem:[%s5148_s7 + $0x5f4] ss:$28 sps:$4 sm:$0xff]  }
 0x2bb   : > { %v1085_v10 = vmax.f32 %v1039_v3, 0.0  ;;  %v1087_v11 = vmax.f32 %v1080_v4, 0.0  ;;  %v3732_v1 = vld [vmem:[%s5148_s7 + $0x5e8] ss:$28 sps:$4 sm:$0xff]   ;;  %v3735_v2 = vld [vmem:[%s5148_s7 + $0x5f0] ss:$28 sps:$4 sm:$0xff]  }
 0x2bc   : > { %v4576_v15 = vpack.c.bf16 %v1084_v7, %v1084_v7  ;;  %v3740_v3 = vld [vmem:[%s5148_s7 + $0x624] ss:$28 sps:$4 sm:$0xff]   ;;  %v3743_v4 = vld [vmem:[%s5148_s7 + $0x62c] ss:$28 sps:$4 sm:$0xff]   ;;  %v672_v7 = vsub.s32 2, %v4348_v38 }
 0x2bd   : > { %v4568_v12 = vpack.c.bf16 %v1085_v10, %v1085_v10  ;;  %v4586_v18 = vpack.c.bf16 %v1087_v11, %v1087_v11  ;;  %v3738_v5 = vld [vmem:[%s5148_s7 + $0x620] ss:$28 sps:$4 sm:$0xff]   ;;  %v3741_v6 = vld [vmem:[%s5148_s7 + $0x628] ss:$28 sps:$4 sm:$0xff]   ;;  %v3744_v10 = vld [vmem:[%s5148_s7 + $0x658] ss:$28 sps:$4 sm:$0xff]  }
 0x2be   : > { %v3746_v8 = vld [vmem:[%s5148_s7 + $0x65c] ss:$28 sps:$4 sm:$0xff]   ;;  %v3749_v9 = vld [vmem:[%s5148_s7 + $0x664] ss:$28 sps:$4 sm:$0xff]  }
 0x2bf   : > { %2569 = vmatprep.mubr.bf16.mxu0 %v4568_v12  ;;  %2651 = vmatprep.mubr.bf16.mxu1 %v4568_v12  ;;  %v3747_v11 = vld [vmem:[%s5148_s7 + $0x660] ss:$28 sps:$4 sm:$0xff]  }
 0x2c0   : > { %2570 = vmatmul.mubr.bf16.vlgmr.msra.gmra.mrb[4].mxu0 %v4576_v15  ;;  %2652 = vmatmul.mubr.bf16.vlgmr.msra.gmra.mrb[12].mxu1 %v4576_v15 }
 0x2c1   : > { %2579 = vmatpush1.bf16.msra.mxu0 %v3666_v13  ;;  %2661 = vmatpush1.bf16.msra.mxu1 %v3669_v14  ;;  %v673_v13 = vrot.slane %v4556_v57, %v672_v7  ;;  %v3752_v14 = vld [vmem:[%s5148_s7 + $0x694] ss:$28 sps:$4 sm:$0xff]  }
 0x2c2   : > { %2610 = vmatprep.mubr.bf16.mxu0 %v4586_v18  ;;  %2692 = vmatprep.mubr.bf16.mxu1 %v4586_v18  ;;  %v3753_v57 = vld [vmem:[%s5148_s7 + $0x698] ss:$28 sps:$4 sm:$0xff]  }
 0x2c3   : > { %2580 = vmatprep.subr.bf16.mxu0 %v3674_v16  ;;  %2662 = vmatprep.subr.bf16.mxu1 %v3677_v17  ;;  %v3755_v16 = vld [vmem:[%s5148_s7 + $0x69c] ss:$28 sps:$4 sm:$0xff]   ;;  %v3750_v17 = vld [vmem:[%s5148_s7 + $0x690] ss:$28 sps:$4 sm:$0xff]  }
 0x2c5   : > { %2581 = vmatpush1.bf16.msra.mxu0 %v3672_v19  ;;  %2663 = vmatpush1.bf16.msra.mxu1 %v3675_v20  ;;  %v1078_v19 = vadd.f32 %v4566_v63, %v673_v13  ;;  %v3758_v20 = vld [vmem:[%s5148_s7 + $0x6cc] ss:$28 sps:$4 sm:$0xff]   ;;  %v3820_v13 = vld [vmem:[%s5148_s7 + $0x600] ss:$28 sps:$4 sm:$0xff]  }
 0x2c6   : > { %2582 = vmatprep.subr.bf16.mxu0 %v3680_v21  ;;  %2664 = vmatprep.subr.bf16.mxu1 %v3683_v22  ;;  %v3761_v21 = vld [vmem:[%s5148_s7 + $0x6d4] ss:$28 sps:$4 sm:$0xff]   ;;  %v3756_v22 = vld [vmem:[%s5148_s7 + $0x6c8] ss:$28 sps:$4 sm:$0xff]  }
 0x2c7   : > { %v3759_v63 = vld [vmem:[%s5148_s7 + $0x6d0] ss:$28 sps:$4 sm:$0xff]  }
 0x2c9   : > { %2583 = vmatpush1.bf16.msra.mxu0 %v3678_v23  ;;  %2665 = vmatpush1.bf16.msra.mxu1 %v3681_v24  ;;  %v1086_v23 = vmax.f32 %v1078_v19, 0.0  ;;  %v3764_v24 = vld [vmem:[%s5148_s7 + $0x14] ss:$28 sps:$4 sm:$0xff]  }
 0x2ca   : > { %2584 = vmatprep.subr.bf16.mxu0 %v3686_v25  ;;  %2666 = vmatprep.subr.bf16.mxu1 %v3689_v26  ;;  %v3765_v25 = vld [vmem:[%s5148_s7 + $0x1d8] ss:$28 sps:$4 sm:$0xff]   ;;  %v3762_v26 = vld [vmem:[%s5148_s7 + $0x10] ss:$28 sps:$4 sm:$0xff]  }
 0x2cb   : > { %v3822_v19 = vld [vmem:[%s5148_s7 + $0x2b0] ss:$28 sps:$4 sm:$0xff]  }
 0x2cd   : > { %2585 = vmatpush1.bf16.msra.mxu0 %v3684_v27  ;;  %2667 = vmatpush1.bf16.msra.mxu1 %v3687_v28  ;;  %v4780_v27 = vpack.c.bf16 %v1086_v23, %v1086_v23  ;;  %v3766_v28 = vld [vmem:[%s5148_s7 + $0x18] ss:$28 sps:$4 sm:$0xff]   ;;  %v3831_v23 = vld [vmem:[%s5148_s7 + $0x4b0] ss:$28 sps:$4 sm:$0xff]  }
 0x2ce   : > { %2586 = vmatprep.subr.bf16.mxu0 %v3692_v29  ;;  %2668 = vmatprep.subr.bf16.mxu1 %v3695_v30  ;;  %v3769_v29 = vld [vmem:[%s5148_s7 + $0x4c] ss:$28 sps:$4 sm:$0xff]  }
 0x2cf   : > { %v3770_v30 = vld [vmem:[%s5148_s7 + $0x210] ss:$28 sps:$4 sm:$0xff]  }
 0x2d1   : > { %2587 = vmatpush1.bf16.msra.mxu0 %v3690_v31  ;;  %2669 = vmatpush1.bf16.msra.mxu1 %v3693_v32  ;;  %v3767_v31 = vld [vmem:[%s5148_s7 + $0x48] ss:$28 sps:$4 sm:$0xff]   ;;  %v3771_v32 = vld [vmem:[%s5148_s7 + $0x50] ss:$28 sps:$4 sm:$0xff]  }
 0x2d2   : > { %2588 = vmatprep.subr.bf16.mxu0 %v3698_v33  ;;  %2670 = vmatprep.subr.bf16.mxu1 %v3701_v34  ;;  %v3774_v33 = vld [vmem:[%s5148_s7 + $0x84] ss:$28 sps:$4 sm:$0xff]  }
 0x2d3   : > { %v3775_v34 = vld [vmem:[%s5148_s7 + $0x248] ss:$28 sps:$4 sm:$0xff]  }
 0x2d5   : > { %2589 = vmatpush1.bf16.msra.mxu0 %v3696_v35  ;;  %2671 = vmatpush1.bf16.msra.mxu1 %v3699_v36  ;;  %v3772_v35 = vld [vmem:[%s5148_s7 + $0x80] ss:$28 sps:$4 sm:$0xff]  }
 0x2d6   : > { %2590 = vmatprep.subr.bf16.mxu0 %v3704_v37  ;;  %2672 = vmatprep.subr.bf16.mxu1 %v3707_v40  ;;  %v3779_v36 = vld [vmem:[%s5148_s7 + $0xbc] ss:$28 sps:$4 sm:$0xff]  }
 0x2d7   : > { %v3780_v37 = vld [vmem:[%s5148_s7 + $0x280] ss:$28 sps:$4 sm:$0xff]   ;;  %v3777_v40 = vld [vmem:[%s5148_s7 + $0xb8] ss:$28 sps:$4 sm:$0xff]  }
 0x2d9   : > { %2591 = vmatpush1.bf16.msra.mxu0 %v3702_v42  ;;  %2673 = vmatpush1.bf16.msra.mxu1 %v3705_v43  ;;  %v3781_v42 = vld [vmem:[%s5148_s7 + $0xc0] ss:$28 sps:$4 sm:$0xff]   ;;  %v3784_v43 = vld [vmem:[%s5148_s7 + $0xf4] ss:$28 sps:$4 sm:$0xff]  }
 0x2da   : > { %2592 = vmatprep.subr.bf16.mxu0 %v3710_v44  ;;  %2674 = vmatprep.subr.bf16.mxu1 %v3713_v45  ;;  %v3785_v44 = vld [vmem:[%s5148_s7 + $0x2b8] ss:$28 sps:$4 sm:$0xff]   ;;  %v3782_v45 = vld [vmem:[%s5148_s7 + $0xf0] ss:$28 sps:$4 sm:$0xff]  }
 0x2dd   : > { %2593 = vmatpush1.bf16.msra.mxu0 %v3708_v46  ;;  %2675 = vmatpush1.bf16.msra.mxu1 %v3711_v47  ;;  %v3786_v46 = vld [vmem:[%s5148_s7 + $0xf8] ss:$28 sps:$4 sm:$0xff]   ;;  %v3789_v47 = vld [vmem:[%s5148_s7 + $0x12c] ss:$28 sps:$4 sm:$0xff]  }
 0x2de   : > { %2594 = vmatprep.subr.bf16.mxu0 %v3716_v48  ;;  %2676 = vmatprep.subr.bf16.mxu1 %v3719_v49  ;;  %v3790_v48 = vld [vmem:[%s5148_s7 + $0x2f0] ss:$28 sps:$4 sm:$0xff]   ;;  %v3787_v49 = vld [vmem:[%s5148_s7 + $0x128] ss:$28 sps:$4 sm:$0xff]  }
 0x2e1   : > { %2595 = vmatpush1.bf16.msra.mxu0 %v3714_v50  ;;  %2677 = vmatpush1.bf16.msra.mxu1 %v3717_v51  ;;  %v3791_v50 = vld [vmem:[%s5148_s7 + $0x130] ss:$28 sps:$4 sm:$0xff]   ;;  %v3794_v51 = vld [vmem:[%s5148_s7 + $0x164] ss:$28 sps:$4 sm:$0xff]  }
 0x2e2   : > { %2596 = vmatprep.subr.bf16.mxu0 %v3722_v52  ;;  %2678 = vmatprep.subr.bf16.mxu1 %v3725_v53  ;;  %v3795_v52 = vld [vmem:[%s5148_s7 + $0x328] ss:$28 sps:$4 sm:$0xff]   ;;  %v3792_v53 = vld [vmem:[%s5148_s7 + $0x160] ss:$28 sps:$4 sm:$0xff]  }
 0x2e5   : > { %2597 = vmatpush1.bf16.msra.mxu0 %v3720_v54  ;;  %2679 = vmatpush1.bf16.msra.mxu1 %v3723_v55  ;;  %v3796_v54 = vld [vmem:[%s5148_s7 + $0x168] ss:$28 sps:$4 sm:$0xff]   ;;  %v3799_v55 = vld [vmem:[%s5148_s7 + $0x19c] ss:$28 sps:$4 sm:$0xff]  }
 0x2e6   : > { %2598 = vmatprep.subr.bf16.mxu0 %v3728_v56  ;;  %2680 = vmatprep.subr.bf16.mxu1 %v3731_v59  ;;  %v3800_v56 = vld [vmem:[%s5148_s7 + $0x360] ss:$28 sps:$4 sm:$0xff]   ;;  %v3797_v59 = vld [vmem:[%s5148_s7 + $0x198] ss:$28 sps:$4 sm:$0xff]  }
 0x2e9   : > { %2599 = vmatpush1.bf16.msra.mxu0 %v3726_v60  ;;  %2681 = vmatpush1.bf16.msra.mxu1 %v3729_v61  ;;  %v3801_v60 = vld [vmem:[%s5148_s7 + $0x1a0] ss:$28 sps:$4 sm:$0xff]   ;;  %v3804_v61 = vld [vmem:[%s5148_s7 + $0x1d4] ss:$28 sps:$4 sm:$0xff]  }
 0x2ea   : > { %2600 = vmatprep.subr.bf16.mxu0 %v3734_v62  ;;  %2682 = vmatprep.subr.bf16.mxu1 %v3737_v0  ;;  %v3805_v62 = vld [vmem:[%s5148_s7 + $0x558] ss:$28 sps:$4 sm:$0xff]   ;;  %v3802_v0 = vld [vmem:[%s5148_s7 + $0x1d0] ss:$28 sps:$4 sm:$0xff]  }
 0x2ed   : > { %2601 = vmatpush1.bf16.msra.mxu0 %v3732_v1  ;;  %2683 = vmatpush1.bf16.msra.mxu1 %v3735_v2  ;;  %v3806_v1 = vld [vmem:[%s5148_s7 + $0x398] ss:$28 sps:$4 sm:$0xff]   ;;  %v3809_v2 = vld [vmem:[%s5148_s7 + $0x20c] ss:$28 sps:$4 sm:$0xff]  }
 0x2ee   : > { %2602 = vmatprep.subr.bf16.mxu0 %v3740_v3  ;;  %2684 = vmatprep.subr.bf16.mxu1 %v3743_v4  ;;  %v3810_v3 = vld [vmem:[%s5148_s7 + $0x590] ss:$28 sps:$4 sm:$0xff]   ;;  %v3807_v4 = vld [vmem:[%s5148_s7 + $0x208] ss:$28 sps:$4 sm:$0xff]  }
 0x2f1   : > { %2603 = vmatpush1.bf16.msra.mxu0 %v3738_v5  ;;  %2685 = vmatpush1.bf16.msra.mxu1 %v3741_v6  ;;  %v3811_v5 = vld [vmem:[%s5148_s7 + $0x3d0] ss:$28 sps:$4 sm:$0xff]   ;;  %v3814_v6 = vld [vmem:[%s5148_s7 + $0x244] ss:$28 sps:$4 sm:$0xff]  }
 0x2f2   : > { %2604 = vmatprep.subr.bf16.mxu0 %v3746_v8  ;;  %2686 = vmatprep.subr.bf16.mxu1 %v3749_v9  ;;  %v3815_v8 = vld [vmem:[%s5148_s7 + $0x5c8] ss:$28 sps:$4 sm:$0xff]   ;;  %v3812_v9 = vld [vmem:[%s5148_s7 + $0x240] ss:$28 sps:$4 sm:$0xff]  }
 0x2f5   : > { %2605 = vmatpush1.bf16.msra.mxu0 %v3744_v10  ;;  %2687 = vmatpush1.bf16.msra.mxu1 %v3747_v11  ;;  %v3816_v10 = vld [vmem:[%s5148_s7 + $0x408] ss:$28 sps:$4 sm:$0xff]   ;;  %v3819_v11 = vld [vmem:[%s5148_s7 + $0x27c] ss:$28 sps:$4 sm:$0xff]  }
 0x2f6   : > { %2606 = vmatprep.subr.bf16.mxu0 %v3752_v14  ;;  %2688 = vmatprep.subr.bf16.mxu1 %v3755_v16  ;;  %v3817_v14 = vld [vmem:[%s5148_s7 + $0x278] ss:$28 sps:$4 sm:$0xff]   ;;  %v3821_v16 = vld [vmem:[%s5148_s7 + $0x440] ss:$28 sps:$4 sm:$0xff]  }
 0x2f9   : > { %2607 = vmatpush1.bf16.msra.mxu0 %v3750_v17  ;;  %2689 = vmatpush1.bf16.msra.mxu1 %v3753_v57  ;;  %v3824_v17 = vld [vmem:[%s5148_s7 + $0x2b4] ss:$28 sps:$4 sm:$0xff]  }
 0x2fa   : > { %2608 = vmatprep.subr.bf16.mxu0 %v3758_v20  ;;  %2690 = vmatprep.subr.bf16.mxu1 %v3761_v21  ;;  %v3825_v57 = vld [vmem:[%s5148_s7 + $0x638] ss:$28 sps:$4 sm:$0xff]   ;;  %v3829_v21 = vld [vmem:[%s5148_s7 + $0x2ec] ss:$28 sps:$4 sm:$0xff]  }
 0x2fb   : > { %v3826_v20 = vld [vmem:[%s5148_s7 + $0x478] ss:$28 sps:$4 sm:$0xff]  }
 0x2fd   : > { %2609 = vmatpush1.bf16.msra.mxu0 %v3756_v22  ;;  %2691 = vmatpush1.bf16.msra.mxu1 %v3759_v63  ;;  %v3830_v22 = vld [vmem:[%s5148_s7 + $0x670] ss:$28 sps:$4 sm:$0xff]   ;;  %v3827_v63 = vld [vmem:[%s5148_s7 + $0x2e8] ss:$28 sps:$4 sm:$0xff]  }
 0x2fe   : > { %2701 = vmatprep.subr.bf16.mxu0 %v3764_v24  ;;  %3316 = vmatprep.subr.bf16.mxu1 %v3765_v25  ;;  %v3834_v24 = vld [vmem:[%s5148_s7 + $0x324] ss:$28 sps:$4 sm:$0xff]  }
 0x2ff   : > { %v3835_v25 = vld [vmem:[%s5148_s7 + $0x6a8] ss:$28 sps:$4 sm:$0xff]  }
 0x300   : > { %2611 = vmatmul.mubr.bf16.vlgmr.msra.gmra.mrb[4].mxu0 %v4780_v27  ;;  %2693 = vmatmul.mubr.bf16.vlgmr.msra.gmra.mrb[12].mxu1 %v4780_v27 }
 0x301   : > { %2702 = vmatpush1.bf16.msra.mxu0 %v3762_v26  ;;  %2733 = vmatprep.mubr.bf16.mxu0 %v4568_v12  ;;  %v3832_v26 = vld [vmem:[%s5148_s7 + $0x320] ss:$28 sps:$4 sm:$0xff]  }
 0x302   : > { %3317 = vmatpush3.bf16.msra.mxu1 %v3766_v28  ;;  %2815 = vmatprep.mubr.bf16.mxu1 %v4568_v12  ;;  %v3776_v12 = vld [vmem:[%s5148_s7 + $0x88] ss:$28 sps:$4 sm:$0xff]  }
 0x303   : > { %2703 = vmatprep.subr.bf16.mxu0 %v3769_v29  ;;  %3318 = vmatprep.subr.bf16.mxu1 %v3770_v30  ;;  %v3836_v28 = vld [vmem:[%s5148_s7 + $0x4e8] ss:$28 sps:$4 sm:$0xff]   ;;  %v3839_v29 = vld [vmem:[%s5148_s7 + $0x35c] ss:$28 sps:$4 sm:$0xff]  }
 0x304   : > { %v3840_v30 = vld [vmem:[%s5148_s7 + $0x6e0] ss:$28 sps:$4 sm:$0xff]  }
 0x305   : > { %2704 = vmatpush1.bf16.msra.mxu0 %v3767_v31  ;;  %v3837_v31 = vld [vmem:[%s5148_s7 + $0x358] ss:$28 sps:$4 sm:$0xff]  }
 0x306   : > { %3319 = vmatpush3.bf16.msra.mxu1 %v3771_v32  ;;  %2705 = vmatprep.subr.bf16.mxu0 %v3774_v33  ;;  %v3841_v32 = vld [vmem:[%s5148_s7 + $0x520] ss:$28 sps:$4 sm:$0xff]   ;;  %v3844_v33 = vld [vmem:[%s5148_s7 + $0x394] ss:$28 sps:$4 sm:$0xff]  }
 0x307   : > { %3320 = vmatprep.subr.bf16.mxu1 %v3775_v34  ;;  %v3842_v34 = vld [vmem:[%s5148_s7 + $0x390] ss:$28 sps:$4 sm:$0xff]  }
 0x309   : > { %2706 = vmatpush1.bf16.msra.mxu0 %v3772_v35  ;;  %v3847_v35 = vld [vmem:[%s5148_s7 + $0x3cc] ss:$28 sps:$4 sm:$0xff]  }
 0x30a   : > { %3321 = vmatpush3.bf16.msra.mxu1 %v3776_v12  ;;  %2707 = vmatprep.subr.bf16.mxu0 %v3779_v36  ;;  %v3845_v12 = vld [vmem:[%s5148_s7 + $0x3c8] ss:$28 sps:$4 sm:$0xff]  }
 0x30b   : > { %3322 = vmatprep.subr.bf16.mxu1 %v3780_v37  ;;  %v3850_v36 = vld [vmem:[%s5148_s7 + $0x404] ss:$28 sps:$4 sm:$0xff]  }
 0x30c   : > { %v3848_v37 = vld [vmem:[%s5148_s7 + $0x400] ss:$28 sps:$4 sm:$0xff]  }
 0x30d   : > { %2708 = vmatpush1.bf16.msra.mxu0 %v3777_v40  ;;  %v3856_v40 = vld [vmem:[%s5148_s7 + $0x474] ss:$28 sps:$4 sm:$0xff]  }
 0x30e   : > { %3323 = vmatpush3.bf16.msra.mxu1 %v3781_v42  ;;  %2709 = vmatprep.subr.bf16.mxu0 %v3784_v43  ;;  %v3854_v42 = vld [vmem:[%s5148_s7 + $0x470] ss:$28 sps:$4 sm:$0xff]  }
 0x30f   : > { %3324 = vmatprep.subr.bf16.mxu1 %v3785_v44  ;;  %v3859_v43 = vld [vmem:[%s5148_s7 + $0x4ac] ss:$28 sps:$4 sm:$0xff]  }
 0x310   : > { %v3857_v44 = vld [vmem:[%s5148_s7 + $0x4a8] ss:$28 sps:$4 sm:$0xff]  }
 0x311   : > { %2710 = vmatpush1.bf16.msra.mxu0 %v3782_v45  ;;  %v3862_v45 = vld [vmem:[%s5148_s7 + $0x4e4] ss:$28 sps:$4 sm:$0xff]  }
 0x312   : > { %3325 = vmatpush3.bf16.msra.mxu1 %v3786_v46  ;;  %2711 = vmatprep.subr.bf16.mxu0 %v3789_v47  ;;  %v3860_v46 = vld [vmem:[%s5148_s7 + $0x4e0] ss:$28 sps:$4 sm:$0xff]  }
 0x313   : > { %3326 = vmatprep.subr.bf16.mxu1 %v3790_v48  ;;  %v3865_v47 = vld [vmem:[%s5148_s7 + $0x51c] ss:$28 sps:$4 sm:$0xff]  }
 0x314   : > { %v3863_v48 = vld [vmem:[%s5148_s7 + $0x518] ss:$28 sps:$4 sm:$0xff]  }
 0x315   : > { %2712 = vmatpush1.bf16.msra.mxu0 %v3787_v49  ;;  %v3868_v49 = vld [vmem:[%s5148_s7 + $0x554] ss:$28 sps:$4 sm:$0xff]  }
 0x316   : > { %3327 = vmatpush3.bf16.msra.mxu1 %v3791_v50  ;;  %2713 = vmatprep.subr.bf16.mxu0 %v3794_v51  ;;  %v3866_v50 = vld [vmem:[%s5148_s7 + $0x550] ss:$28 sps:$4 sm:$0xff]  }
 0x317   : > { %3328 = vmatprep.subr.bf16.mxu1 %v3795_v52  ;;  %v3871_v51 = vld [vmem:[%s5148_s7 + $0x58c] ss:$28 sps:$4 sm:$0xff]  }
 0x318   : > { %v3869_v52 = vld [vmem:[%s5148_s7 + $0x588] ss:$28 sps:$4 sm:$0xff]  }
 0x319   : > { %2714 = vmatpush1.bf16.msra.mxu0 %v3792_v53  ;;  %v3874_v53 = vld [vmem:[%s5148_s7 + $0x5c4] ss:$28 sps:$4 sm:$0xff]  }
 0x31a   : > { %3329 = vmatpush3.bf16.msra.mxu1 %v3796_v54  ;;  %2715 = vmatprep.subr.bf16.mxu0 %v3799_v55  ;;  %v3872_v54 = vld [vmem:[%s5148_s7 + $0x5c0] ss:$28 sps:$4 sm:$0xff]  }
 0x31b   : > { %3330 = vmatprep.subr.bf16.mxu1 %v3800_v56  ;;  %v3877_v55 = vld [vmem:[%s5148_s7 + $0x5fc] ss:$28 sps:$4 sm:$0xff]  }
 0x31c   : > { %v3875_v56 = vld [vmem:[%s5148_s7 + $0x5f8] ss:$28 sps:$4 sm:$0xff]  }
 0x31d   : > { %2716 = vmatpush1.bf16.msra.mxu0 %v3797_v59  ;;  %v3880_v59 = vld [vmem:[%s5148_s7 + $0x634] ss:$28 sps:$4 sm:$0xff]  }
 0x31e   : > { %3331 = vmatpush3.bf16.msra.mxu1 %v3801_v60  ;;  %2717 = vmatprep.subr.bf16.mxu0 %v3804_v61  ;;  %v3878_v60 = vld [vmem:[%s5148_s7 + $0x630] ss:$28 sps:$4 sm:$0xff]  }
 0x31f   : > { %3338 = vmatprep.subr.bf16.mxu1 %v3805_v62  ;;  %v3883_v61 = vld [vmem:[%s5148_s7 + $0x66c] ss:$28 sps:$4 sm:$0xff]  }
 0x320   : > { %v3881_v62 = vld [vmem:[%s5148_s7 + $0x668] ss:$28 sps:$4 sm:$0xff]  }
 0x321   : > { %2816 = vmatmul.mubr.bf16.vlgmr.msra.gmra.mrb[16].mxu1 %v4576_v15  ;;  %2718 = vmatpush1.bf16.msra.mxu0 %v3802_v0  ;;  %v3886_v0 = vld [vmem:[%s5148_s7 + $0x6a4] ss:$28 sps:$4 sm:$0xff]  }
 0x322   : > { %3339 = vmatpush3.bf16.msra.mxu1 %v3806_v1  ;;  %2855 = vmatprep.mubr.bf16.mxu1 %v4586_v18  ;;  %v3884_v1 = vld [vmem:[%s5148_s7 + $0x6a0] ss:$28 sps:$4 sm:$0xff]  }
 0x323   : > { %2719 = vmatprep.subr.bf16.mxu0 %v3809_v2  ;;  %3340 = vmatprep.subr.bf16.mxu1 %v3810_v3  ;;  %v3889_v2 = vld [vmem:[%s5148_s7 + $0x6dc] ss:$28 sps:$4 sm:$0xff]  }
 0x324   : > { %v3887_v3 = vld [vmem:[%s5148_s7 + $0x6d8] ss:$28 sps:$4 sm:$0xff]  }
 0x325   : > { %2720 = vmatpush1.bf16.msra.mxu0 %v3807_v4  ;;  %v1348_v4 = vld [vmem:[%s5149_s8] sm:$0x7f] }
 0x326   : > { %3341 = vmatpush3.bf16.msra.mxu1 %v3811_v5  ;;  %2721 = vmatprep.subr.bf16.mxu0 %v3814_v6  ;;  %v1353_v5 = vrot.slane %v1348_v4, %v4351_v39  ;;  %v1361_v6 = vrot.slane %v1348_v4, %v672_v7 }
 0x327   : > { %3342 = vmatprep.subr.bf16.mxu1 %v3815_v8  ;;  %v1357_v8 = vrot.slane %v1348_v4, %v4357_v41 }
 0x329   : > { %2722 = vmatpush1.bf16.msra.mxu0 %v3812_v9  ;;  %v1365_v9 = vrot.slane %v1348_v4, %v676_v58 }
 0x32a   : > { %3343 = vmatpush3.bf16.msra.mxu1 %v3816_v10  ;;  %2723 = vmatprep.subr.bf16.mxu0 %v3819_v11 }
 0x32b   : > { %3344 = vmatprep.subr.bf16.mxu1 %v3820_v13 }
 0x32d   : > { %2724 = vmatpush1.bf16.msra.mxu0 %v3817_v14 }
 0x32e   : > { %3345 = vmatpush3.bf16.msra.mxu1 %v3821_v16  ;;  %2725 = vmatprep.subr.bf16.mxu0 %v3824_v17 }
 0x32f   : > { %3346 = vmatprep.subr.bf16.mxu1 %v3825_v57 }
 0x331   : > { %2726 = vmatpush1.bf16.msra.mxu0 %v3822_v19 }
 0x332   : > { %3347 = vmatpush3.bf16.msra.mxu1 %v3826_v20  ;;  %2727 = vmatprep.subr.bf16.mxu0 %v3829_v21 }
 0x333   : > { %3348 = vmatprep.subr.bf16.mxu1 %v3830_v22 }
 0x335   : > { %2728 = vmatpush1.bf16.msra.mxu0 %v3827_v63 }
 0x336   : > { %3349 = vmatpush3.bf16.msra.mxu1 %v3831_v23  ;;  %2729 = vmatprep.subr.bf16.mxu0 %v3834_v24 }
 0x337   : > { %3350 = vmatprep.subr.bf16.mxu1 %v3835_v25 }
 0x339   : > { %2730 = vmatpush1.bf16.msra.mxu0 %v3832_v26 }
 0x33a   : > { %3351 = vmatpush3.bf16.msra.mxu1 %v3836_v28  ;;  %2731 = vmatprep.subr.bf16.mxu0 %v3839_v29 }
 0x33b   : > { %3352 = vmatprep.subr.bf16.mxu1 %v3840_v30  ;;  %v1376_v30 = vsub.s32 6, %v4348_v38 }
 0x33d   : > { %2732 = vmatpush1.bf16.msra.mxu0 %v3837_v31  ;;  %v1377_v31 = vrot.slane %v1348_v4, %v1376_v30 }
 0x33e   : > { %3353 = vmatpush3.bf16.msra.mxu1 %v3841_v32  ;;  %2742 = vmatprep.subr.bf16.mxu0 %v3844_v33 }
 0x340   : > { %2734 = vmatmul.mubr.bf16.vlgmr.msra.gmra.mrb[8].mxu0 %v4576_v15  ;;  %v3853_v15 = vld [vmem:[%s5148_s7 + $0x43c] ss:$28 sps:$4 sm:$0xff]  }
 0x341   : > { %2856 = vmatmul.mubr.bf16.vlgmr.msra.gmra.mrb[20].mxu1 %v4780_v27  ;;  %2743 = vmatpush1.bf16.msra.mxu0 %v3842_v34 }
 0x342   : > { %2774 = vmatprep.mubr.bf16.mxu0 %v4586_v18  ;;  %2744 = vmatprep.subr.bf16.mxu0 %v3847_v35  ;;  %v3851_v18 = vld [vmem:[%s5148_s7 + $0x438] ss:$28 sps:$4 sm:$0xff]  }
 0x345   : > { %2745 = vmatpush1.bf16.msra.mxu0 %v3845_v12 }
 0x346   : > { %2746 = vmatprep.subr.bf16.mxu0 %v3850_v36 }
 0x349   : > { %2747 = vmatpush1.bf16.msra.mxu0 %v3848_v37 }
 0x34a   : > { %2748 = vmatprep.subr.bf16.mxu0 %v3853_v15 }
 0x34d   : > { %2749 = vmatpush1.bf16.msra.mxu0 %v3851_v18 }
 0x34e   : > { %2750 = vmatprep.subr.bf16.mxu0 %v3856_v40  ;;  %v1368_v40 = vsub.s32 4, %v4348_v38 }
 0x351   : > { %2751 = vmatpush1.bf16.msra.mxu0 %v3854_v42  ;;  %v1372_v42 = vsub.s32 5, %v4348_v38 }
 0x352   : > { %2752 = vmatprep.subr.bf16.mxu0 %v3859_v43  ;;  %v1369_v43 = vrot.slane %v1348_v4, %v1368_v40 }
 0x355   : > { %2753 = vmatpush1.bf16.msra.mxu0 %v3857_v44  ;;  %v1373_v44 = vrot.slane %v1348_v4, %v1372_v42 }
 0x356   : > { %2754 = vmatprep.subr.bf16.mxu0 %v3862_v45 }
 0x359   : > { %2755 = vmatpush1.bf16.msra.mxu0 %v3860_v46 }
 0x35a   : > { %2756 = vmatprep.subr.bf16.mxu0 %v3865_v47 }
 0x35d   : > { %2757 = vmatpush1.bf16.msra.mxu0 %v3863_v48 }
 0x35e   : > { %2758 = vmatprep.subr.bf16.mxu0 %v3868_v49 }
 0x361   : > { %2759 = vmatpush1.bf16.msra.mxu0 %v3866_v50 }
 0x362   : > { %2760 = vmatprep.subr.bf16.mxu0 %v3871_v51 }
 0x365   : > { %2761 = vmatpush1.bf16.msra.mxu0 %v3869_v52 }
 0x366   : > { %2762 = vmatprep.subr.bf16.mxu0 %v3874_v53 }
 0x369   : > { %2763 = vmatpush1.bf16.msra.mxu0 %v3872_v54 }
 0x36a   : > { %2764 = vmatprep.subr.bf16.mxu0 %v3877_v55 }
 0x36d   : > { %2765 = vmatpush1.bf16.msra.mxu0 %v3875_v56 }
 0x36e   : > { %2766 = vmatprep.subr.bf16.mxu0 %v3880_v59 }
 0x371   : > { %2767 = vmatpush1.bf16.msra.mxu0 %v3878_v60 }
 0x372   : > { %2768 = vmatprep.subr.bf16.mxu0 %v3883_v61 }
 0x375   : > { %2769 = vmatpush1.bf16.msra.mxu0 %v3881_v62 }
 0x376   : > { %2770 = vmatprep.subr.bf16.mxu0 %v3886_v0 }
 0x379   : > { %2771 = vmatpush1.bf16.msra.mxu0 %v3884_v1 }
 0x37a   : > { %2772 = vmatprep.subr.bf16.mxu0 %v3889_v2 }
 0x37d   : > { %2773 = vmatpush1.bf16.msra.mxu0 %v3887_v3 }
 0x380   : > { %2775 = vmatmul.mubr.bf16.vlgmr.msra.gmra.mrb[8].mxu0 %v4780_v27 }
 0x3d3   : > { %v2612_v10 = vpop.f32.mrb[4].mxu0  ;;  %v2694_v11 = vpop.f32.mrb[12].mxu1 }
 0x3d4   : > { %v3380_v13 = vadd.f32 %v2612_v10, %v1353_v5  ;;  %v3382_v27 = vadd.f32 %v2694_v11, %v1361_v6  ;;  %v2614_v14 = vpop.f32.mrb[5].mxu0  ;;  %v2696_v16 = vpop.f32.mrb[13].mxu1 }
 0x3d5   : > { %v3381_v17 = vadd.f32 %v2614_v14, %v1357_v8  ;;  %v3383_v57 = vadd.f32 %v2696_v16, %v1365_v9  ;;  %v2616_v19 = vpop.f32.mrb[6].mxu0  ;;  %v2698_v39 = vpop.f32.mrb[14].mxu1 }
 0x3d6   : > { %3890 = vtanh.f32 %v3380_v13  ;;  %v2617_v20 = vpop.f32.mrb[7].mxu0  ;;  %v2699_v7 = vpop.f32.mrb[15].mxu1 }
 0x3d7   : > { %3892 = vtanh.f32 %v3382_v27 }
 0x3d8   : > { %3894 = vtanh.f32 %v3381_v17 }
 0x3d9   : > { %3896 = vtanh.f32 %v3383_v57 }
 0x3e0   : > { %v3891_v41 = vpop.eup %3890 }
 0x3e1   : > { %v3893_v58 = vpop.eup %3892 }
 0x3e2   : > { %v3895_v21 = vpop.eup %3894 }
 0x3e3   : > { %v3897_v22 = vpop.eup %3896  ;;  %v3303_v63 = vpack.c.bf16 %v3895_v21, %v3891_v41 }
 0x3e4   : > { %v3304_v23 = vpack.c.bf16 %v3897_v22, %v3893_v58 }
 0x3e5   : > { %2899 = vst [vmem:[%s5083_s25] sm:$0xff] %v3303_v63 }
 0x3e6   : > { %2900 = vst [vmem:[%s5083_s25 + $0x8] sm:$0xff] %v3304_v23 }
 0x3f4   : > { %v3332_v24 = vpop.f32.mrb[16].mxu1 }
 0x3f5   : > { %v3333_v25 = vpop.f32.mrb[17].mxu1 }
 0x3f6   : > { %v3334_v26 = vadd.f32 %v3333_v25, %v3332_v24  ;;  %v3335_v28 = vpop.f32.mrb[18].mxu1 }
 0x3f7   : > { %v3336_v29 = vpop.f32.mrb[19].mxu1 }
 0x3f8   : > { %v2818_v34 = vadd.f32 %v3334_v26, %v1377_v31 }
 0x414   : > { %v3354_v32 = vpop.f32.mrb[20].mxu1 }
 0x415   : > { %v3355_v33 = vpop.f32.mrb[21].mxu1 }
 0x416   : > { %v3356_v35 = vadd.f32 %v3355_v33, %v3354_v32  ;;  %v3357_v12 = vpop.f32.mrb[22].mxu1 }
 0x417   : > { %v3358_v36 = vpop.f32.mrb[23].mxu1 }
 0x418   : > { %v2858_v37 = vadd.f32 %v3356_v35, %v2818_v34 }
 0x41a   : > { %3898 = vtanh.f32 %v2858_v37 }
 0x424   : > { %v3899_v15 = vpop.eup %3898 }
 0x425   : > { %v3306_v18 = vpack.c.bf16 %v3899_v15, %v3899_v15 }
 0x427   : > { %2903 = vst.msk [vmem:[%s5083_s25 + $0x18] sm:$0xf] %vm2902_vm1, %v3306_v18 }
 0x453   : > { %v2776_v45 = vpop.f32.mrb[8].mxu0 }
 0x454   : > { %v3384_v46 = vadd.f32 %v2776_v45, %v1369_v43  ;;  %v2778_v47 = vpop.f32.mrb[9].mxu0 }
 0x455   : > { %v3385_v48 = vadd.f32 %v2778_v47, %v1373_v44  ;;  %v2780_v49 = vpop.f32.mrb[10].mxu0 }
 0x456   : > { %3900 = vtanh.f32 %v3384_v46  ;;  %v2781_v50 = vpop.f32.mrb[11].mxu0 }
 0x457   : > { %3902 = vtanh.f32 %v3385_v48 }
 0x460   : > { %v3901_v51 = vpop.eup %3900 }
 0x461   : > { %v3903_v52 = vpop.eup %3902 }
 0x462   : > { %v3305_v53 = vpack.c.bf16 %v3903_v52, %v3901_v51 }
 0x464   : > { %2901 = vst [vmem:[%s5083_s25 + $0x10] sm:$0xff] %v3305_v53 }
 0x465   : > { %3917 = shalt.err (!%p3914_p3)
}
 0x466   : > { %s3918_s21 = scalar_lea.hbm %s5096_s29, 448  ;;  %s3922_s26 = scalar_lea.hbm %s5150_s9, 896 }
 0x467   : > { %p3919_p4 = scmp.ne.s32.totalorder %s5096_s29, %s3918_s21  ;;  %p3923_p9 = scmp.lt.u32.totalorder %s5096_s29, %s5150_s9 }
 0x468   : > { %p3924_p10 = scmp.lt.u32.totalorder %s3922_s26, %s3918_s21  ;;  %p3926_p12 = scmp.lt.u32.totalorder %s3918_s21, %s5096_s29 }
 0x469   : > { %p3920_p7 = pnand %p3919_p4, %p4060_p5 }
 0x46a   : > { %p3925_p11 = por %p3924_p10, %p3923_p9 }
 0x46b   : > { %p3921_p8 = pneg %p3920_p7 }
 0x46c   : > { %p3927_p13 = por %p3926_p12, %p3925_p11 }
 0x46e   : > { %p3928_p0 = pnand %p3927_p13, %p3921_p8 }
 0x470   : > { %3931 = shalt.err (!%p3928_p0)
}
 0x471   : > { %3400 = dma.vmem_to_hbm [thread:$0]  (%p4060_p5), %s5098_s24, 448, %s5096_s29, %s2905_s14  }
 0x472 PF: > { %p3406_p1 = scmp.ge.s32.totalorder %s3966_s12, 2  ;;  %s2931_s16 = sand.u32 1, %s3954_s30  }
 0x473   : > { %s2932_s13 = scalar_lea.sflag [#allocation3], %s2931_s16 }
 0x474   : > { %p3403_p2 = pnand %p3406_p1, %p4064_p6 }
 0x476   : > { %3949 = dma.done.wait (!%p3403_p2), %s2932_s13, 448  }
 0x477   : > { %3951 = vsyncadd (!%p3403_p2), %s2932_s13, 4294966848  ;;  %p19_p3 = scmp.ge.s32.totalorder %s4047_s15, 4   ;;  %s5153_s30 = smov %s3958_s10 }
 0x478   : > { %s5154_s10 = smov %s3962_s11  ;;  %s5155_s11 = smov %s4058_s18 }
 0x479   : > { %s5156_s12 = smov %s4047_s15  ;;  %21 = sbr.rel (!%p19_p3) target bundleno = 3 (0x3), region = 91 }
 0x480   :  { %2937 = vsyncpa [#allocation3], 1 }
 0x481   :  { %2939 = vsyncpa [#allocation3 + $0x1], 1 }

</bundles_post_ra>
